<compile_context>
chip_gen: v5e
topology: v5e:2x2
jax: 0.10.0
libtpu: 0.0.40
codegen_flags: <defaults>
</compile_context>

<pallas_src>
import jax
import jax.numpy as jnp
from jax import lax
from jax.experimental import pallas as pl
from jax.experimental.pallas import tpu as pltpu

_PAD_L = 8  # sublane-aligned left offset of h1 inside its padded VMEM scratch


def _round_up(a, b):
    return (a + b - 1) // b * b


def _pad_to(x, target, axis):
    pad = target - x.shape[axis]
    if pad == 0:
        return x
    widths = [(0, 0)] * x.ndim
    widths[axis] = (0, pad)
    return jnp.pad(x, widths)


# ---------------------------------------------------------------------------
# Fused BottleBlock kernel (one image per grid step)
# ---------------------------------------------------------------------------

def _make_fused_kernel(*, kh1, kw1, hi, wi, ci, ho, wo, cin, stride,
                       res_from_act, res_off, cmid_p, cout_p):
    """Build the fused kernel for one static configuration."""
    m = ho * wo

    def kernel(x_ref, w1_ref, w2_ref, s1_ref, b1_ref, s2_ref, b2_ref, rw_ref,
               o_ref, act_ref, h1p_ref):
        # ---- bn1 + relu fused; conv zero-padding positions forced back to 0
        x = x_ref[0]                                    # (hi, wi, ci) f32
        s1 = s1_ref[...].reshape(1, 1, ci)
        b1 = b1_ref[...].reshape(1, 1, ci)
        pre = jnp.maximum(x * s1 + b1, 0.0)
        r = lax.broadcasted_iota(jnp.int32, (hi, wi, ci), 0)
        c = lax.broadcasted_iota(jnp.int32, (hi, wi, ci), 1)
        if stride == 1:
            is_pad = (r == 0) | (r == hi - 1) | (c == 0) | (c == wi - 1)
        else:
            # space-to-depth layout: channel q = dy*2*cin + dx*cin + c
            q = lax.broadcasted_iota(jnp.int32, (hi, wi, ci), 2)
            dy1 = q >= 2 * cin
            dx1 = ((q >= cin) & (q < 2 * cin)) | (q >= 3 * cin)
            is_pad = (((r == 0) & jnp.logical_not(dy1)) |
                      ((r == hi - 1) & dy1) |
                      ((c == 0) & jnp.logical_not(dx1)) |
                      ((c == wi - 1) & dx1))
        act = jnp.where(is_pad, 0.0, pre)
        act_ref[...] = act                              # lives in VMEM only

        # ---- conv1 as kh1*kw1 shifted MXU matmuls, bn2+relu epilogue -------
        acc1 = jnp.zeros((m, cmid_p), jnp.float32)
        for ky in range(kh1):
            for kx in range(kw1):
                a = act_ref[pl.ds(ky, ho), pl.ds(kx, wo), :]
                a = a.reshape(m, ci).astype(jnp.bfloat16)
                acc1 = acc1 + jnp.dot(a, w1_ref[ky * kw1 + kx],
                                      preferred_element_type=jnp.float32)
        h1 = jnp.maximum(acc1 * s2_ref[...] + b2_ref[...], 0.0)
        # TODO(synk): training-mode dropout (drop_rate > 0) not implemented.

        # ---- h1, spatially zero-padded, stays in VMEM scratch ---------------
        h1p_ref[...] = jnp.zeros_like(h1p_ref)
        h1p_ref[pl.ds(1, ho), pl.ds(_PAD_L, wo), :] = h1.reshape(ho, wo, cmid_p)

        # ---- conv2 (3x3, stride 1) as 9 shifted MXU matmuls -----------------
        acc2 = jnp.zeros((m, cout_p), jnp.float32)
        for ky in range(3):
            for kx in range(3):
                a = h1p_ref[pl.ds(ky, ho), pl.ds(_PAD_L - 1 + kx, wo), :]
                a = a.reshape(m, cmid_p).astype(jnp.bfloat16)
                acc2 = acc2 + jnp.dot(a, w2_ref[ky * 3 + kx],
                                      preferred_element_type=jnp.float32)

        # ---- fused residual / 1x1 shortcut: one more (f32) matmul -----------
        if res_from_act:
            res = act_ref[pl.ds(res_off, ho), pl.ds(res_off, wo), :]
        else:
            res = x[res_off:res_off + ho, res_off:res_off + wo, :]
        res = res.reshape(m, ci)
        acc2 = acc2 + jnp.dot(res, rw_ref[...],
                              preferred_element_type=jnp.float32)

        o_ref[0] = acc2.reshape(ho, wo, cout_p).astype(o_ref.dtype)

    return kernel


# ---------------------------------------------------------------------------
# Wrapper: BottleBlock forward (eval mode)
# ---------------------------------------------------------------------------

def bottle_block_forward(x, params, stride, equal_in_out):
    """Eval-mode BottleBlock forward. x: (N, Cin, H, W) float32 (NCHW)."""
    n, cin, h, w = x.shape
    w1 = params["conv1_w"]                              # (Cmid, Cin, 3, 3)
    w2 = params["conv2_w"]                              # (Cout, Cmid, 3, 3)
    cmid = w1.shape[0]
    cout = w2.shape[0]

    if stride not in (1, 2):
        raise ValueError("stride must be 1 or 2")
    if equal_in_out and (stride != 1 or cout != cin):
        raise ValueError("equal_in_out requires stride == 1 and cin == cout")
    if stride == 1 and w % 8:
        raise ValueError("W must be a multiple of 8")
    if stride == 2 and (h % 2 or w % 16):
        raise ValueError("stride 2 requires even H and W % 16 == 0")

    # lane-dense padding for the narrow toy / early-WRN channel counts
    cmid_p = _round_up(cmid, 128) if cmid < 128 else _round_up(cmid, 8)
    cout_p = _round_up(cout, 128) if cout < 128 else _round_up(cout, 8)

    x_nhwc = jnp.transpose(x, (0, 2, 3, 1)).astype(jnp.float32)
    xp = jnp.pad(x_nhwc, ((0, 0), (1, 1), (1, 1), (0, 0)))  # spatial halo

    if stride == 1:
        xin = xp                                         # (N, H+2, W+2, Cin)
        ci = cin
        ho, wo = h, w
        kh1 = kw1 = 3
        w1m = jnp.transpose(w1, (2, 3, 1, 0)).reshape(9, cin, cmid)
        s1 = params["bn1_scale"]
        b1 = params["bn1_shift"]
    else:
        # space-to-depth: 3x3/stride-2 conv -> 2x2/stride-1 conv on 4*Cin chans
        hp2, wp2 = (h + 2) // 2, (w + 2) // 2
        xin = xp.reshape(n, hp2, 2, wp2, 2, cin)
        xin = xin.transpose(0, 1, 3, 2, 4, 5).reshape(n, hp2, wp2, 4 * cin)
        ci = 4 * cin
        ho, wo = h // 2, w // 2
        kh1 = kw1 = 2
        w1t = jnp.transpose(w1, (2, 3, 1, 0))            # (3,3,Cin,Cmid)
        w1t = jnp.pad(w1t, ((0, 1), (0, 1), (0, 0), (0, 0)))
        w1m = w1t.reshape(2, 2, 2, 2, cin, cmid)
        w1m = w1m.transpose(0, 2, 1, 3, 4, 5).reshape(4, 4 * cin, cmid)
        s1 = jnp.tile(params["bn1_scale"], 4)
        b1 = jnp.tile(params["bn1_shift"], 4)

    w1m = _pad_to(w1m, cmid_p, 2).astype(jnp.bfloat16)
    w2m = jnp.transpose(w2, (2, 3, 1, 0)).reshape(9, cmid, cout)
    w2m = _pad_to(_pad_to(w2m, cmid_p, 1), cout_p, 2).astype(jnp.bfloat16)

    s1 = s1.reshape(1, ci).astype(jnp.float32)
    b1 = b1.reshape(1, ci).astype(jnp.float32)
    s2 = _pad_to(params["bn2_scale"].reshape(1, cmid), cmid_p, 1)
    b2 = _pad_to(params["bn2_shift"].reshape(1, cmid), cmid_p, 1)
    s2 = s2.astype(jnp.float32)
    b2 = b2.astype(jnp.float32)

    if equal_in_out:
        rw = _pad_to(jnp.eye(cin, dtype=jnp.float32), cout_p, 1)
        res_from_act = False
        res_off = 1
    else:
        wsc = params["convSC_w"].reshape(cout, cin)      # (Cout, Cin, 1, 1)
        wsc_m = _pad_to(jnp.transpose(wsc, (1, 0)).astype(jnp.float32),
                        cout_p, 1)
        res_from_act = True
        if stride == 2:
            # shortcut reads the (dy=1, dx=1) phase -> zero all other K rows
            rw = jnp.zeros((4 * cin, cout_p), jnp.float32)
            rw = rw.at[3 * cin:4 * cin, :].set(wsc_m)
            res_off = 0
        else:
            rw = wsc_m
            res_off = 1

    hi, wi = xin.shape[1], xin.shape[2]
    kernel = _make_fused_kernel(
        kh1=kh1, kw1=kw1, hi=hi, wi=wi, ci=ci, ho=ho, wo=wo, cin=cin,
        stride=stride, res_from_act=res_from_act, res_off=res_off,
        cmid_p=cmid_p, cout_p=cout_p)

    out = pl.pallas_call(
        kernel,
        out_shape=jax.ShapeDtypeStruct((n, ho, wo, cout_p), jnp.float32),
        grid_spec=pltpu.PrefetchScalarGridSpec(
            num_scalar_prefetch=0,
            grid=(n,),
            in_specs=[
                pl.BlockSpec((1, hi, wi, ci), lambda i: (i, 0, 0, 0)),
                pl.BlockSpec(w1m.shape, lambda i: (0, 0, 0)),
                pl.BlockSpec(w2m.shape, lambda i: (0, 0, 0)),
                pl.BlockSpec(s1.shape, lambda i: (0, 0)),
                pl.BlockSpec(b1.shape, lambda i: (0, 0)),
                pl.BlockSpec(s2.shape, lambda i: (0, 0)),
                pl.BlockSpec(b2.shape, lambda i: (0, 0)),
                pl.BlockSpec(rw.shape, lambda i: (0, 0)),
            ],
            out_specs=pl.BlockSpec((1, ho, wo, cout_p),
                                   lambda i: (i, 0, 0, 0)),
            scratch_shapes=[
                pltpu.VMEM((hi, wi, ci), jnp.float32),                 # act
                pltpu.VMEM((ho + 2, wo + _PAD_L + 8, cmid_p),          # h1 pad
                           jnp.float32),
            ],
        ),
        compiler_params=pltpu.CompilerParams(
            dimension_semantics=("parallel",),
            vmem_limit_bytes=64 * 1024 * 1024,
        ),
    )(xin, w1m, w2m, s1, b1, s2, b2, rw)

    out = out[..., :cout]                                # drop lane padding
    return jnp.transpose(out, (0, 3, 1, 2)).astype(x.dtype)


# ---------------------------------------------------------------------------
# Pure-JAX reference (lax conv) and parameter construction
# ---------------------------------------------------------------------------

def _conv2d_ref(x, w, stride, padding):
    return jax.lax.conv_general_dilated(
        x, w, window_strides=(stride, stride),
        padding=[(padding, padding), (padding, padding)],
        dimension_numbers=("NCHW", "OIHW", "NCHW"),
        precision=jax.lax.Precision.HIGHEST)


def bottle_block_ref(x, params, stride, equal_in_out):
    s1 = params["bn1_scale"][None, :, None, None]
    b1 = params["bn1_shift"][None, :, None, None]
    act = jnp.maximum(x * s1 + b1, 0.0)
    h = _conv2d_ref(act, params["conv1_w"], stride, 1)
    s2 = params["bn2_scale"][None, :, None, None]
    b2 = params["bn2_shift"][None, :, None, None]
    h = jnp.maximum(h * s2 + b2, 0.0)
    out = _conv2d_ref(h, params["conv2_w"], 1, 1)
    res = x if equal_in_out else _conv2d_ref(act, params["convSC_w"], stride, 0)
    return out + res


def make_params(key, cin, cmid, cout, equal_in_out):
    ks = jax.random.split(key, 11)
    eps = 1e-5

    def folded_bn(kg, kb, km, kv, c):
        gamma = 1.0 + 0.1 * jax.random.normal(kg, (c,), dtype=jnp.float32)
        beta = 0.1 * jax.random.normal(kb, (c,), dtype=jnp.float32)
        mean = 0.1 * jax.random.normal(km, (c,), dtype=jnp.float32)
        var = jax.random.uniform(kv, (c,), minval=0.5, maxval=1.5,
                                 dtype=jnp.float32)
        scale = gamma / jnp.sqrt(var + eps)
        shift = beta - mean * scale
        return scale, shift

    s1, b1 = folded_bn(ks[0], ks[1], ks[2], ks[3], cin)
    s2, b2 = folded_bn(ks[4], ks[5], ks[6], ks[7], cmid)
    w1 = jax.random.normal(ks[8], (cmid, cin, 3, 3), dtype=jnp.float32)
    w1 = w1 * (2.0 / (9 * cin)) ** 0.5
    w2 = jax.random.normal(ks[9], (cout, cmid, 3, 3), dtype=jnp.float32)
    w2 = w2 * (2.0 / (9 * cmid)) ** 0.5
    p = {"bn1_scale": s1, "bn1_shift": b1, "conv1_w": w1,
         "bn2_scale": s2, "bn2_shift": b2, "conv2_w": w2}
    if not equal_in_out:
        wsc = jax.random.normal(ks[10], (cout, cin, 1, 1), dtype=jnp.float32)
        p["convSC_w"] = wsc * (2.0 / cin) ** 0.5
    return p


# ---------------------------------------------------------------------------
# Demo / self-check
# ---------------------------------------------------------------------------

if __name__ == "__main__":
    root = jax.random.PRNGKey(0)
    k_x, k_p1, k_p2 = jax.random.split(root, 3)

    N, H, W = 2, 16, 16
    fwd = jax.jit(bottle_block_forward,
                  static_argnames=("stride", "equal_in_out"))

    # Case 1: downsampling block (in=4 -> out=8, stride=2) -> uses convShortcut.
    cin, cmid, cout, stride = 4, 4, 8, 2
    x = jax.random.normal(k_x, (N, cin, H, W), dtype=jnp.float32)
    p1 = make_params(k_p1, cin, cmid, cout, equal_in_out=False)
    y1 = jax.block_until_ready(fwd(x, p1, stride=stride, equal_in_out=False))
    r1 = bottle_block_ref(x, p1, stride, False)
    assert y1.shape == (N, cout, H // stride, W // stride)
    assert y1.dtype == x.dtype
    err1 = float(jnp.max(jnp.abs(y1 - r1)))
    assert jnp.allclose(y1, r1, rtol=5e-2, atol=5e-2), err1

    # Case 2: identity-residual block (in == out == 4, stride=1).
    cin2, cmid2, cout2, stride2 = 4, 6, 4, 1
    p2 = make_params(k_p2, cin2, cmid2, cout2, equal_in_out=True)
    y2 = jax.block_until_ready(fwd(x, p2, stride=stride2, equal_in_out=True))
    r2 = bottle_block_ref(x, p2, stride2, True)
    assert y2.shape == x.shape and y2.dtype == x.dtype
    err2 = float(jnp.max(jnp.abs(y2 - r2)))
    assert jnp.allclose(y2, r2, rtol=5e-2, atol=5e-2), err2

    print("KERNEL_OK")
</pallas_src>

<mosaic_0001>
module attributes {stable_mosaic.version = 11 : i64} {
  func.func @kernel(%arg0: i32, %arg1: memref<1x9x9x16xf32, #tpu.memory_space<vmem>>, %arg2: memref<4x16x128xbf16, #tpu.memory_space<vmem>>, %arg3: memref<9x128x128xbf16, #tpu.memory_space<vmem>>, %arg4: memref<1x16xf32, #tpu.memory_space<vmem>>, %arg5: memref<1x16xf32, #tpu.memory_space<vmem>>, %arg6: memref<1x128xf32, #tpu.memory_space<vmem>>, %arg7: memref<1x128xf32, #tpu.memory_space<vmem>>, %arg8: memref<16x128xf32, #tpu.memory_space<vmem>>, %arg9: memref<1x8x8x128xf32, #tpu.memory_space<vmem>>, %arg10: memref<9x9x16xf32, #tpu.memory_space<vmem>>, %arg11: memref<10x24x128xf32, #tpu.memory_space<vmem>>) attributes {dimension_semantics = [#tpu.dimension_semantics<parallel>], iteration_bounds = array<i64: 2>, scalar_prefetch = 0 : i64, scratch_operands = 2 : i64, tpu.core_type = #tpu.core_type<tc>, window_params = [{transform_indices = @transform_0, window_bounds = array<i64: 1, 9, 9, 16>}, {pipeline_mode = #tpu.pipeline_mode<synchronous>, transform_indices = @transform_1, window_bounds = array<i64: 4, 16, 128>}, {pipeline_mode = #tpu.pipeline_mode<synchronous>, transform_indices = @transform_2, window_bounds = array<i64: 9, 128, 128>}, {pipeline_mode = #tpu.pipeline_mode<synchronous>, transform_indices = @transform_3, window_bounds = array<i64: 1, 16>}, {pipeline_mode = #tpu.pipeline_mode<synchronous>, transform_indices = @transform_4, window_bounds = array<i64: 1, 16>}, {pipeline_mode = #tpu.pipeline_mode<synchronous>, transform_indices = @transform_5, window_bounds = array<i64: 1, 128>}, {pipeline_mode = #tpu.pipeline_mode<synchronous>, transform_indices = @transform_6, window_bounds = array<i64: 1, 128>}, {pipeline_mode = #tpu.pipeline_mode<synchronous>, transform_indices = @transform_7, window_bounds = array<i64: 16, 128>}, {transform_indices = @transform_8, window_bounds = array<i64: 1, 8, 8, 128>}]} {
    %c0 = arith.constant 0 : index
    %c0_0 = arith.constant 0 : index
    %c0_1 = arith.constant 0 : index
    %c0_2 = arith.constant 0 : index
    %0 = vector.load %arg1[%c0, %c0_0, %c0_1, %c0_2] : memref<1x9x9x16xf32, #tpu.memory_space<vmem>>, vector<1x9x9x16xf32>
    %1 = vector.shape_cast %0 : vector<1x9x9x16xf32> to vector<9x9x16xf32>
    %c0_3 = arith.constant 0 : index
    %c0_4 = arith.constant 0 : index
    %2 = vector.load %arg4[%c0_3, %c0_4] : memref<1x16xf32, #tpu.memory_space<vmem>>, vector<1x16xf32>
    %3 = vector.shape_cast %2 : vector<1x16xf32> to vector<1x1x16xf32>
    %c0_5 = arith.constant 0 : index
    %c0_6 = arith.constant 0 : index
    %4 = vector.load %arg5[%c0_5, %c0_6] : memref<1x16xf32, #tpu.memory_space<vmem>>, vector<1x16xf32>
    %5 = vector.shape_cast %4 : vector<1x16xf32> to vector<1x1x16xf32>
    %6 = vector.broadcast %3 : vector<1x1x16xf32> to vector<9x9x16xf32>
    %7 = arith.mulf %1, %6 : vector<9x9x16xf32>
    %8 = vector.broadcast %5 : vector<1x1x16xf32> to vector<9x9x16xf32>
    %9 = arith.addf %7, %8 : vector<9x9x16xf32>
    %cst = arith.constant 0.000000e+00 : f32
    %10 = vector.broadcast %cst : f32 to vector<9x9x16xf32>
    %11 = arith.maximumf %9, %10 : vector<9x9x16xf32>
    %12 = tpu.iota {dimensions = array<i32: 0>} : vector<9x9x16xi32>
    %13 = tpu.iota {dimensions = array<i32: 1>} : vector<9x9x16xi32>
    %14 = tpu.iota {dimensions = array<i32: 2>} : vector<9x9x16xi32>
    %c8_i32 = arith.constant 8 : i32
    %15 = vector.broadcast %c8_i32 : i32 to vector<9x9x16xi32>
    %16 = arith.cmpi sge, %14, %15 : vector<9x9x16xi32>
    %c4_i32 = arith.constant 4 : i32
    %17 = vector.broadcast %c4_i32 : i32 to vector<9x9x16xi32>
    %18 = arith.cmpi sge, %14, %17 : vector<9x9x16xi32>
    %c8_i32_7 = arith.constant 8 : i32
    %19 = vector.broadcast %c8_i32_7 : i32 to vector<9x9x16xi32>
    %20 = arith.cmpi slt, %14, %19 : vector<9x9x16xi32>
    %21 = arith.andi %18, %20 : vector<9x9x16xi1>
    %c12_i32 = arith.constant 12 : i32
    %22 = vector.broadcast %c12_i32 : i32 to vector<9x9x16xi32>
    %23 = arith.cmpi sge, %14, %22 : vector<9x9x16xi32>
    %24 = arith.ori %21, %23 : vector<9x9x16xi1>
    %c0_i32 = arith.constant 0 : i32
    %25 = vector.broadcast %c0_i32 : i32 to vector<9x9x16xi32>
    %26 = arith.cmpi eq, %12, %25 : vector<9x9x16xi32>
    %cst_8 = arith.constant dense<true> : vector<9x9x16xi1>
    %27 = arith.xori %16, %cst_8 : vector<9x9x16xi1>
    %28 = arith.andi %26, %27 : vector<9x9x16xi1>
    %c8_i32_9 = arith.constant 8 : i32
    %29 = vector.broadcast %c8_i32_9 : i32 to vector<9x9x16xi32>
    %30 = arith.cmpi eq, %12, %29 : vector<9x9x16xi32>
    %31 = arith.andi %30, %16 : vector<9x9x16xi1>
    %32 = arith.ori %28, %31 : vector<9x9x16xi1>
    %c0_i32_10 = arith.constant 0 : i32
    %33 = vector.broadcast %c0_i32_10 : i32 to vector<9x9x16xi32>
    %34 = arith.cmpi eq, %13, %33 : vector<9x9x16xi32>
    %cst_11 = arith.constant dense<true> : vector<9x9x16xi1>
    %35 = arith.xori %24, %cst_11 : vector<9x9x16xi1>
    %36 = arith.andi %34, %35 : vector<9x9x16xi1>
    %37 = arith.ori %32, %36 : vector<9x9x16xi1>
    %c8_i32_12 = arith.constant 8 : i32
    %38 = vector.broadcast %c8_i32_12 : i32 to vector<9x9x16xi32>
    %39 = arith.cmpi eq, %13, %38 : vector<9x9x16xi32>
    %40 = arith.andi %39, %24 : vector<9x9x16xi1>
    %41 = arith.ori %37, %40 : vector<9x9x16xi1>
    %cst_13 = arith.constant 0.000000e+00 : f32
    %42 = vector.broadcast %cst_13 : f32 to vector<9x9x16xf32>
    %43 = arith.select %41, %42, %11 : vector<9x9x16xi1>, vector<9x9x16xf32>
    %c0_14 = arith.constant 0 : index
    %c0_15 = arith.constant 0 : index
    %c0_16 = arith.constant 0 : index
    %44 = vector.load %arg10[%c0_14, %c0_15, %c0_16] : memref<9x9x16xf32, #tpu.memory_space<vmem>>, vector<9x9x16xf32>
    tpu.vector_store %arg10[%c0_14, %c0_15, %c0_16], %43 {strides = array<i32>} : memref<9x9x16xf32, #tpu.memory_space<vmem>>, vector<9x9x16xf32>,
    %cst_17 = arith.constant 0.000000e+00 : f32
    %45 = vector.broadcast %cst_17 : f32 to vector<64x128xf32>
    %c0_18 = arith.constant 0 : index
    %c0_19 = arith.constant 0 : index
    %c0_20 = arith.constant 0 : index
    %46 = vector.load %arg10[%c0_18, %c0_19, %c0_20] : memref<9x9x16xf32, #tpu.memory_space<vmem>>, vector<8x8x16xf32>
    %47 = vector.shape_cast %46 : vector<8x8x16xf32> to vector<64x16xf32>
    %48 = arith.truncf %47 : vector<64x16xf32> to vector<64x16xbf16>
    %c0_21 = arith.constant 0 : index
    %c0_22 = arith.constant 0 : index
    %c0_23 = arith.constant 0 : index
    %49 = vector.load %arg2[%c0_21, %c0_22, %c0_23] : memref<4x16x128xbf16, #tpu.memory_space<vmem>>, vector<1x16x128xbf16>
    %50 = vector.shape_cast %49 : vector<1x16x128xbf16> to vector<16x128xbf16>
    %cst_24 = arith.constant dense<0.000000e+00> : vector<64x128xf32>
    %51 = tpu.matmul %48, %50, %cst_24 {dimension_numbers = #tpu.dot_dimension_numbers<[1], [0], [0], [1], [0, 0, 1, 1], [], []>} : vector<64x16xbf16>, vector<16x128xbf16>, vector<64x128xf32> -> vector<64x128xf32>
    %52 = arith.addf %45, %51 : vector<64x128xf32>
    %c0_25 = arith.constant 0 : index
    %c1 = arith.constant 1 : index
    %c0_26 = arith.constant 0 : index
    %53 = vector.load %arg10[%c0_25, %c1, %c0_26] : memref<9x9x16xf32, #tpu.memory_space<vmem>>, vector<8x8x16xf32>
    %54 = vector.shape_cast %53 : vector<8x8x16xf32> to vector<64x16xf32>
    %55 = arith.truncf %54 : vector<64x16xf32> to vector<64x16xbf16>
    %c1_27 = arith.constant 1 : index
    %c0_28 = arith.constant 0 : index
    %c0_29 = arith.constant 0 : index
    %56 = vector.load %arg2[%c1_27, %c0_28, %c0_29] : memref<4x16x128xbf16, #tpu.memory_space<vmem>>, vector<1x16x128xbf16>
    %57 = vector.shape_cast %56 : vector<1x16x128xbf16> to vector<16x128xbf16>
    %cst_30 = arith.constant dense<0.000000e+00> : vector<64x128xf32>
    %58 = tpu.matmul %55, %57, %cst_30 {dimension_numbers = #tpu.dot_dimension_numbers<[1], [0], [0], [1], [0, 0, 1, 1], [], []>} : vector<64x16xbf16>, vector<16x128xbf16>, vector<64x128xf32> -> vector<64x128xf32>
    %59 = arith.addf %52, %58 : vector<64x128xf32>
    %c1_31 = arith.constant 1 : index
    %c0_32 = arith.constant 0 : index
    %c0_33 = arith.constant 0 : index
    %60 = vector.load %arg10[%c1_31, %c0_32, %c0_33] : memref<9x9x16xf32, #tpu.memory_space<vmem>>, vector<8x8x16xf32>
    %61 = vector.shape_cast %60 : vector<8x8x16xf32> to vector<64x16xf32>
    %62 = arith.truncf %61 : vector<64x16xf32> to vector<64x16xbf16>
    %c2 = arith.constant 2 : index
    %c0_34 = arith.constant 0 : index
    %c0_35 = arith.constant 0 : index
    %63 = vector.load %arg2[%c2, %c0_34, %c0_35] : memref<4x16x128xbf16, #tpu.memory_space<vmem>>, vector<1x16x128xbf16>
    %64 = vector.shape_cast %63 : vector<1x16x128xbf16> to vector<16x128xbf16>
    %cst_36 = arith.constant dense<0.000000e+00> : vector<64x128xf32>
    %65 = tpu.matmul %62, %64, %cst_36 {dimension_numbers = #tpu.dot_dimension_numbers<[1], [0], [0], [1], [0, 0, 1, 1], [], []>} : vector<64x16xbf16>, vector<16x128xbf16>, vector<64x128xf32> -> vector<64x128xf32>
    %66 = arith.addf %59, %65 : vector<64x128xf32>
    %c1_37 = arith.constant 1 : index
    %c1_38 = arith.constant 1 : index
    %c0_39 = arith.constant 0 : index
    %67 = vector.load %arg10[%c1_37, %c1_38, %c0_39] : memref<9x9x16xf32, #tpu.memory_space<vmem>>, vector<8x8x16xf32>
    %68 = vector.shape_cast %67 : vector<8x8x16xf32> to vector<64x16xf32>
    %69 = arith.truncf %68 : vector<64x16xf32> to vector<64x16xbf16>
    %c3 = arith.constant 3 : index
    %c0_40 = arith.constant 0 : index
    %c0_41 = arith.constant 0 : index
    %70 = vector.load %arg2[%c3, %c0_40, %c0_41] : memref<4x16x128xbf16, #tpu.memory_space<vmem>>, vector<1x16x128xbf16>
    %71 = vector.shape_cast %70 : vector<1x16x128xbf16> to vector<16x128xbf16>
    %cst_42 = arith.constant dense<0.000000e+00> : vector<64x128xf32>
    %72 = tpu.matmul %69, %71, %cst_42 {dimension_numbers = #tpu.dot_dimension_numbers<[1], [0], [0], [1], [0, 0, 1, 1], [], []>} : vector<64x16xbf16>, vector<16x128xbf16>, vector<64x128xf32> -> vector<64x128xf32>
    %73 = arith.addf %66, %72 : vector<64x128xf32>
    %c0_43 = arith.constant 0 : index
    %c0_44 = arith.constant 0 : index
    %74 = vector.load %arg6[%c0_43, %c0_44] : memref<1x128xf32, #tpu.memory_space<vmem>>, vector<1x128xf32>
    %75 = vector.broadcast %74 : vector<1x128xf32> to vector<64x128xf32>
    %76 = arith.mulf %73, %75 : vector<64x128xf32>
    %c0_45 = arith.constant 0 : index
    %c0_46 = arith.constant 0 : index
    %77 = vector.load %arg7[%c0_45, %c0_46] : memref<1x128xf32, #tpu.memory_space<vmem>>, vector<1x128xf32>
    %78 = vector.broadcast %77 : vector<1x128xf32> to vector<64x128xf32>
    %79 = arith.addf %76, %78 : vector<64x128xf32>
    %cst_47 = arith.constant 0.000000e+00 : f32
    %80 = vector.broadcast %cst_47 : f32 to vector<64x128xf32>
    %81 = arith.maximumf %79, %80 : vector<64x128xf32>
    %cst_48 = arith.constant 0.000000e+00 : f32
    %82 = vector.broadcast %cst_48 : f32 to vector<10x24x128xf32>
    %c0_49 = arith.constant 0 : index
    %c0_50 = arith.constant 0 : index
    %c0_51 = arith.constant 0 : index
    %83 = vector.load %arg11[%c0_49, %c0_50, %c0_51] : memref<10x24x128xf32, #tpu.memory_space<vmem>>, vector<10x24x128xf32>
    tpu.vector_store %arg11[%c0_49, %c0_50, %c0_51], %82 {strides = array<i32>} : memref<10x24x128xf32, #tpu.memory_space<vmem>>, vector<10x24x128xf32>,
    %84 = vector.shape_cast %81 : vector<64x128xf32> to vector<8x8x128xf32>
    %c1_52 = arith.constant 1 : index
    %c8 = arith.constant 8 : index
    %c0_53 = arith.constant 0 : index
    %85 = vector.load %arg11[%c1_52, %c8, %c0_53] : memref<10x24x128xf32, #tpu.memory_space<vmem>>, vector<8x8x128xf32>
    tpu.vector_store %arg11[%c1_52, %c8, %c0_53], %84 {strides = array<i32>} : memref<10x24x128xf32, #tpu.memory_space<vmem>>, vector<8x8x128xf32>,
    %cst_54 = arith.constant 0.000000e+00 : f32
    %86 = vector.broadcast %cst_54 : f32 to vector<64x128xf32>
    %c0_55 = arith.constant 0 : index
    %c7 = arith.constant 7 : index
    %c0_56 = arith.constant 0 : index
    %87 = vector.load %arg11[%c0_55, %c7, %c0_56] : memref<10x24x128xf32, #tpu.memory_space<vmem>>, vector<8x8x128xf32>
    %88 = vector.shape_cast %87 : vector<8x8x128xf32> to vector<64x128xf32>
    %89 = arith.truncf %88 : vector<64x128xf32> to vector<64x128xbf16>
    %c0_57 = arith.constant 0 : index
    %c0_58 = arith.constant 0 : index
    %c0_59 = arith.constant 0 : index
    %90 = vector.load %arg3[%c0_57, %c0_58, %c0_59] : memref<9x128x128xbf16, #tpu.memory_space<vmem>>, vector<1x128x128xbf16>
    %91 = vector.shape_cast %90 : vector<1x128x128xbf16> to vector<128x128xbf16>
    %cst_60 = arith.constant dense<0.000000e+00> : vector<64x128xf32>
    %92 = tpu.matmul %89, %91, %cst_60 {dimension_numbers = #tpu.dot_dimension_numbers<[1], [0], [0], [1], [0, 0, 1, 1], [], []>} : vector<64x128xbf16>, vector<128x128xbf16>, vector<64x128xf32> -> vector<64x128xf32>
    %93 = arith.addf %86, %92 : vector<64x128xf32>
    %c0_61 = arith.constant 0 : index
    %c8_62 = arith.constant 8 : index
    %c0_63 = arith.constant 0 : index
    %94 = vector.load %arg11[%c0_61, %c8_62, %c0_63] : memref<10x24x128xf32, #tpu.memory_space<vmem>>, vector<8x8x128xf32>
    %95 = vector.shape_cast %94 : vector<8x8x128xf32> to vector<64x128xf32>
    %96 = arith.truncf %95 : vector<64x128xf32> to vector<64x128xbf16>
    %c1_64 = arith.constant 1 : index
    %c0_65 = arith.constant 0 : index
    %c0_66 = arith.constant 0 : index
    %97 = vector.load %arg3[%c1_64, %c0_65, %c0_66] : memref<9x128x128xbf16, #tpu.memory_space<vmem>>, vector<1x128x128xbf16>
    %98 = vector.shape_cast %97 : vector<1x128x128xbf16> to vector<128x128xbf16>
    %cst_67 = arith.constant dense<0.000000e+00> : vector<64x128xf32>
    %99 = tpu.matmul %96, %98, %cst_67 {dimension_numbers = #tpu.dot_dimension_numbers<[1], [0], [0], [1], [0, 0, 1, 1], [], []>} : vector<64x128xbf16>, vector<128x128xbf16>, vector<64x128xf32> -> vector<64x128xf32>
    %100 = arith.addf %93, %99 : vector<64x128xf32>
    %c0_68 = arith.constant 0 : index
    %c9 = arith.constant 9 : index
    %c0_69 = arith.constant 0 : index
    %101 = vector.load %arg11[%c0_68, %c9, %c0_69] : memref<10x24x128xf32, #tpu.memory_space<vmem>>, vector<8x8x128xf32>
    %102 = vector.shape_cast %101 : vector<8x8x128xf32> to vector<64x128xf32>
    %103 = arith.truncf %102 : vector<64x128xf32> to vector<64x128xbf16>
    %c2_70 = arith.constant 2 : index
    %c0_71 = arith.constant 0 : index
    %c0_72 = arith.constant 0 : index
    %104 = vector.load %arg3[%c2_70, %c0_71, %c0_72] : memref<9x128x128xbf16, #tpu.memory_space<vmem>>, vector<1x128x128xbf16>
    %105 = vector.shape_cast %104 : vector<1x128x128xbf16> to vector<128x128xbf16>
    %cst_73 = arith.constant dense<0.000000e+00> : vector<64x128xf32>
    %106 = tpu.matmul %103, %105, %cst_73 {dimension_numbers = #tpu.dot_dimension_numbers<[1], [0], [0], [1], [0, 0, 1, 1], [], []>} : vector<64x128xbf16>, vector<128x128xbf16>, vector<64x128xf32> -> vector<64x128xf32>
    %107 = arith.addf %100, %106 : vector<64x128xf32>
    %c1_74 = arith.constant 1 : index
    %c7_75 = arith.constant 7 : index
    %c0_76 = arith.constant 0 : index
    %108 = vector.load %arg11[%c1_74, %c7_75, %c0_76] : memref<10x24x128xf32, #tpu.memory_space<vmem>>, vector<8x8x128xf32>
    %109 = vector.shape_cast %108 : vector<8x8x128xf32> to vector<64x128xf32>
    %110 = arith.truncf %109 : vector<64x128xf32> to vector<64x128xbf16>
    %c3_77 = arith.constant 3 : index
    %c0_78 = arith.constant 0 : index
    %c0_79 = arith.constant 0 : index
    %111 = vector.load %arg3[%c3_77, %c0_78, %c0_79] : memref<9x128x128xbf16, #tpu.memory_space<vmem>>, vector<1x128x128xbf16>
    %112 = vector.shape_cast %111 : vector<1x128x128xbf16> to vector<128x128xbf16>
    %cst_80 = arith.constant dense<0.000000e+00> : vector<64x128xf32>
    %113 = tpu.matmul %110, %112, %cst_80 {dimension_numbers = #tpu.dot_dimension_numbers<[1], [0], [0], [1], [0, 0, 1, 1], [], []>} : vector<64x128xbf16>, vector<128x128xbf16>, vector<64x128xf32> -> vector<64x128xf32>
    %114 = arith.addf %107, %113 : vector<64x128xf32>
    %c1_81 = arith.constant 1 : index
    %c8_82 = arith.constant 8 : index
    %c0_83 = arith.constant 0 : index
    %115 = vector.load %arg11[%c1_81, %c8_82, %c0_83] : memref<10x24x128xf32, #tpu.memory_space<vmem>>, vector<8x8x128xf32>
    %116 = vector.shape_cast %115 : vector<8x8x128xf32> to vector<64x128xf32>
    %117 = arith.truncf %116 : vector<64x128xf32> to vector<64x128xbf16>
    %c4 = arith.constant 4 : index
    %c0_84 = arith.constant 0 : index
    %c0_85 = arith.constant 0 : index
    %118 = vector.load %arg3[%c4, %c0_84, %c0_85] : memref<9x128x128xbf16, #tpu.memory_space<vmem>>, vector<1x128x128xbf16>
    %119 = vector.shape_cast %118 : vector<1x128x128xbf16> to vector<128x128xbf16>
    %cst_86 = arith.constant dense<0.000000e+00> : vector<64x128xf32>
    %120 = tpu.matmul %117, %119, %cst_86 {dimension_numbers = #tpu.dot_dimension_numbers<[1], [0], [0], [1], [0, 0, 1, 1], [], []>} : vector<64x128xbf16>, vector<128x128xbf16>, vector<64x128xf32> -> vector<64x128xf32>
    %121 = arith.addf %114, %120 : vector<64x128xf32>
    %c1_87 = arith.constant 1 : index
    %c9_88 = arith.constant 9 : index
    %c0_89 = arith.constant 0 : index
    %122 = vector.load %arg11[%c1_87, %c9_88, %c0_89] : memref<10x24x128xf32, #tpu.memory_space<vmem>>, vector<8x8x128xf32>
    %123 = vector.shape_cast %122 : vector<8x8x128xf32> to vector<64x128xf32>
    %124 = arith.truncf %123 : vector<64x128xf32> to vector<64x128xbf16>
    %c5 = arith.constant 5 : index
    %c0_90 = arith.constant 0 : index
    %c0_91 = arith.constant 0 : index
    %125 = vector.load %arg3[%c5, %c0_90, %c0_91] : memref<9x128x128xbf16, #tpu.memory_space<vmem>>, vector<1x128x128xbf16>
    %126 = vector.shape_cast %125 : vector<1x128x128xbf16> to vector<128x128xbf16>
    %cst_92 = arith.constant dense<0.000000e+00> : vector<64x128xf32>
    %127 = tpu.matmul %124, %126, %cst_92 {dimension_numbers = #tpu.dot_dimension_numbers<[1], [0], [0], [1], [0, 0, 1, 1], [], []>} : vector<64x128xbf16>, vector<128x128xbf16>, vector<64x128xf32> -> vector<64x128xf32>
    %128 = arith.addf %121, %127 : vector<64x128xf32>
    %c2_93 = arith.constant 2 : index
    %c7_94 = arith.constant 7 : index
    %c0_95 = arith.constant 0 : index
    %129 = vector.load %arg11[%c2_93, %c7_94, %c0_95] : memref<10x24x128xf32, #tpu.memory_space<vmem>>, vector<8x8x128xf32>
    %130 = vector.shape_cast %129 : vector<8x8x128xf32> to vector<64x128xf32>
    %131 = arith.truncf %130 : vector<64x128xf32> to vector<64x128xbf16>
    %c6 = arith.constant 6 : index
    %c0_96 = arith.constant 0 : index
    %c0_97 = arith.constant 0 : index
    %132 = vector.load %arg3[%c6, %c0_96, %c0_97] : memref<9x128x128xbf16, #tpu.memory_space<vmem>>, vector<1x128x128xbf16>
    %133 = vector.shape_cast %132 : vector<1x128x128xbf16> to vector<128x128xbf16>
    %cst_98 = arith.constant dense<0.000000e+00> : vector<64x128xf32>
    %134 = tpu.matmul %131, %133, %cst_98 {dimension_numbers = #tpu.dot_dimension_numbers<[1], [0], [0], [1], [0, 0, 1, 1], [], []>} : vector<64x128xbf16>, vector<128x128xbf16>, vector<64x128xf32> -> vector<64x128xf32>
    %135 = arith.addf %128, %134 : vector<64x128xf32>
    %c2_99 = arith.constant 2 : index
    %c8_100 = arith.constant 8 : index
    %c0_101 = arith.constant 0 : index
    %136 = vector.load %arg11[%c2_99, %c8_100, %c0_101] : memref<10x24x128xf32, #tpu.memory_space<vmem>>, vector<8x8x128xf32>
    %137 = vector.shape_cast %136 : vector<8x8x128xf32> to vector<64x128xf32>
    %138 = arith.truncf %137 : vector<64x128xf32> to vector<64x128xbf16>
    %c7_102 = arith.constant 7 : index
    %c0_103 = arith.constant 0 : index
    %c0_104 = arith.constant 0 : index
    %139 = vector.load %arg3[%c7_102, %c0_103, %c0_104] : memref<9x128x128xbf16, #tpu.memory_space<vmem>>, vector<1x128x128xbf16>
    %140 = vector.shape_cast %139 : vector<1x128x128xbf16> to vector<128x128xbf16>
    %cst_105 = arith.constant dense<0.000000e+00> : vector<64x128xf32>
    %141 = tpu.matmul %138, %140, %cst_105 {dimension_numbers = #tpu.dot_dimension_numbers<[1], [0], [0], [1], [0, 0, 1, 1], [], []>} : vector<64x128xbf16>, vector<128x128xbf16>, vector<64x128xf32> -> vector<64x128xf32>
    %142 = arith.addf %135, %141 : vector<64x128xf32>
    %c2_106 = arith.constant 2 : index
    %c9_107 = arith.constant 9 : index
    %c0_108 = arith.constant 0 : index
    %143 = vector.load %arg11[%c2_106, %c9_107, %c0_108] : memref<10x24x128xf32, #tpu.memory_space<vmem>>, vector<8x8x128xf32>
    %144 = vector.shape_cast %143 : vector<8x8x128xf32> to vector<64x128xf32>
    %145 = arith.truncf %144 : vector<64x128xf32> to vector<64x128xbf16>
    %c8_109 = arith.constant 8 : index
    %c0_110 = arith.constant 0 : index
    %c0_111 = arith.constant 0 : index
    %146 = vector.load %arg3[%c8_109, %c0_110, %c0_111] : memref<9x128x128xbf16, #tpu.memory_space<vmem>>, vector<1x128x128xbf16>
    %147 = vector.shape_cast %146 : vector<1x128x128xbf16> to vector<128x128xbf16>
    %cst_112 = arith.constant dense<0.000000e+00> : vector<64x128xf32>
    %148 = tpu.matmul %145, %147, %cst_112 {dimension_numbers = #tpu.dot_dimension_numbers<[1], [0], [0], [1], [0, 0, 1, 1], [], []>} : vector<64x128xbf16>, vector<128x128xbf16>, vector<64x128xf32> -> vector<64x128xf32>
    %149 = arith.addf %142, %148 : vector<64x128xf32>
    %c0_113 = arith.constant 0 : index
    %c0_114 = arith.constant 0 : index
    %c0_115 = arith.constant 0 : index
    %150 = vector.load %arg10[%c0_113, %c0_114, %c0_115] : memref<9x9x16xf32, #tpu.memory_space<vmem>>, vector<8x8x16xf32>
    %151 = vector.shape_cast %150 : vector<8x8x16xf32> to vector<64x16xf32>
    %c0_116 = arith.constant 0 : index
    %c0_117 = arith.constant 0 : index
    %152 = vector.load %arg8[%c0_116, %c0_117] : memref<16x128xf32, #tpu.memory_space<vmem>>, vector<16x128xf32>
    %cst_118 = arith.constant dense<0.000000e+00> : vector<64x128xf32>
    %153 = tpu.matmul %151, %152, %cst_118 {dimension_numbers = #tpu.dot_dimension_numbers<[1], [0], [0], [1], [0, 0, 1, 1], [], []>} : vector<64x16xf32>, vector<16x128xf32>, vector<64x128xf32> -> vector<64x128xf32>
    %154 = arith.addf %149, %153 : vector<64x128xf32>
    %155 = vector.shape_cast %154 : vector<64x128xf32> to vector<8x8x128xf32>
    %c0_119 = arith.constant 0 : index
    %c0_120 = arith.constant 0 : index
    %c0_121 = arith.constant 0 : index
    %c0_122 = arith.constant 0 : index
    %156 = vector.load %arg9[%c0_119, %c0_120, %c0_121, %c0_122] : memref<1x8x8x128xf32, #tpu.memory_space<vmem>>, vector<1x8x8x128xf32>
    %157 = vector.shape_cast %156 : vector<1x8x8x128xf32> to vector<8x8x128xf32>
    %158 = vector.shape_cast %155 : vector<8x8x128xf32> to vector<1x8x8x128xf32>
    tpu.vector_store %arg9[%c0_119, %c0_120, %c0_121, %c0_122], %158 {strides = array<i32>} : memref<1x8x8x128xf32, #tpu.memory_space<vmem>>, vector<1x8x8x128xf32>,
    return
  }
  func.func @transform_0(%arg0: i32) -> (i32, i32, i32, i32) {
    %c0_i32 = arith.constant 0 : i32
    %c0_i32_0 = arith.constant 0 : i32
    %c0_i32_1 = arith.constant 0 : i32
    %c0_i32_2 = arith.constant 0 : i32
    return %arg0, %c0_i32, %c0_i32_0, %c0_i32_1 : i32, i32, i32, i32
  }
  func.func @transform_1(%arg0: i32) -> (i32, i32, i32) {
    %c0_i32 = arith.constant 0 : i32
    %c0_i32_0 = arith.constant 0 : i32
    %c0_i32_1 = arith.constant 0 : i32
    %c0_i32_2 = arith.constant 0 : i32
    return %c0_i32, %c0_i32_0, %c0_i32_1 : i32, i32, i32
  }
  func.func @transform_2(%arg0: i32) -> (i32, i32, i32) {
    %c0_i32 = arith.constant 0 : i32
    %c0_i32_0 = arith.constant 0 : i32
    %c0_i32_1 = arith.constant 0 : i32
    %c0_i32_2 = arith.constant 0 : i32
    return %c0_i32, %c0_i32_0, %c0_i32_1 : i32, i32, i32
  }
  func.func @transform_3(%arg0: i32) -> (i32, i32) {
    %c0_i32 = arith.constant 0 : i32
    %c0_i32_0 = arith.constant 0 : i32
    %c0_i32_1 = arith.constant 0 : i32
    return %c0_i32, %c0_i32_0 : i32, i32
  }
  func.func @transform_4(%arg0: i32) -> (i32, i32) {
    %c0_i32 = arith.constant 0 : i32
    %c0_i32_0 = arith.constant 0 : i32
    %c0_i32_1 = arith.constant 0 : i32
    return %c0_i32, %c0_i32_0 : i32, i32
  }
  func.func @transform_5(%arg0: i32) -> (i32, i32) {
    %c0_i32 = arith.constant 0 : i32
    %c0_i32_0 = arith.constant 0 : i32
    %c0_i32_1 = arith.constant 0 : i32
    return %c0_i32, %c0_i32_0 : i32, i32
  }
  func.func @transform_6(%arg0: i32) -> (i32, i32) {
    %c0_i32 = arith.constant 0 : i32
    %c0_i32_0 = arith.constant 0 : i32
    %c0_i32_1 = arith.constant 0 : i32
    return %c0_i32, %c0_i32_0 : i32, i32
  }
  func.func @transform_7(%arg0: i32) -> (i32, i32) {
    %c0_i32 = arith.constant 0 : i32
    %c0_i32_0 = arith.constant 0 : i32
    %c0_i32_1 = arith.constant 0 : i32
    return %c0_i32, %c0_i32_0 : i32, i32
  }
  func.func @transform_8(%arg0: i32) -> (i32, i32, i32, i32) {
    %c0_i32 = arith.constant 0 : i32
    %c0_i32_0 = arith.constant 0 : i32
    %c0_i32_1 = arith.constant 0 : i32
    %c0_i32_2 = arith.constant 0 : i32
    return %arg0, %c0_i32, %c0_i32_0, %c0_i32_1 : i32, i32, i32, i32
  }
}

</mosaic_0001>

<bundles_post_ra>
// kernel: tile.13
= control target key start
LH: loop header
LB: loop body
LE: loop exit
PB: predicated region body
PF: predicated region fallthrough
CT: control target
= control target key end

     0   :  { %s22_s0 = inlined_call_operand.vmem [shape: f32[4], index: 0, kind: input, shape index: {}]   ;;  %s23_s1 = inlined_call_operand.vmem [shape: f32[4,4], index: 1, kind: output, shape index: {}]  }
   0x1   :  { %v4_v0 = vld [vmem:[%s22_s0] ss:$0 sm:$0xff] }
   0x2   :  { %5 = vst [vmem:[%s23_s1] sm:$0xf] %v4_v0 }

// kernel: tile.18
= control target key start
LH: loop header
LB: loop body
LE: loop exit
PB: predicated region body
PF: predicated region fallthrough
CT: control target
= control target key end

     0   :  { %s37_s8 = smov 4   ;;  %s38_s9 = smov 8   ;;  %vm7_vm0 = vcmask 31744   ;;  %vm13_vm1 = vcmask 130144   ;;  %vm19_vm2 = vcmask 97344   ;;  %vm25_vm3 = vcmask 64544   ;;  %s55_s0 = inlined_call_operand.vmem [shape: f32[4,4], index: 0, kind: input, shape index: {}]   ;;  %s56_s1 = inlined_call_operand.vmem [shape: f32[1,16], index: 1, kind: output, shape index: {}]  }
   0x1   :  { %v4_v0 = vld [vmem:[%s55_s0] sm:$0xf]  ;;  %s36_s0 = smov 12  }
   0x2   :  { %5 = vst [vmem:[#allocation1] sm:$0xf] %v4_v0 }
   0x9   :  { %v10_v1 = vld [vmem:[#allocation1 + $0x3] sm:$0x1]   ;;  %v22_v2 = vld [vmem:[#allocation1 + $0x1] sm:$0x1]   ;;  %v16_v3 = vld [vmem:[#allocation1 + $0x2] sm:$0x1]  }
   0xa   :  { %11 = vrot.lane.b32.xlu0 %v10_v1, %s36_s0  ;;  %23 = vrot.lane.b32.xlu1 %v22_v2, %s37_s8  ;;  %v6_v4 = vld [vmem:[#allocation1] sm:$0x1]  }
   0xb   :  { %8 = vst.msk [vmem:[#allocation0] sm:$0x1] %vm7_vm0, %v6_v4  }
  0x12   :  { %17 = vrot.lane.b32.xlu0 %v16_v3, %s38_s9 }
  0x7c   :  { %v12_v5 = vpop.permute.xlu0 %11   ;;  %v24_v6 = vpop.permute.xlu1 %23  }
  0x7d   :  { %14 = vst.msk [vmem:[#allocation0] sm:$0x1] %vm13_vm1, %v12_v5  }
  0x84   :  { %v18_v7 = vpop.permute.xlu0 %17  }
  0x85   :  { %20 = vst.msk [vmem:[#allocation0] sm:$0x1] %vm19_vm2, %v18_v7  }
  0x86   :  { %26 = vst.msk [vmem:[#allocation0] sm:$0x1] %vm25_vm3, %v24_v6  }
  0x8d   :  { %v29_v8 = vld [vmem:[#allocation0] sm:$0x1] }
  0x8e   :  { %32 = vst [vmem:[%s56_s1] sm:$0x1] %v29_v8 }

// kernel: bottle_block_forward.1
= control target key start
LH: loop header
LB: loop body
LE: loop exit
PB: predicated region body
PF: predicated region fallthrough
CT: control target
= control target key end

     0   :  { %s2577_s27 = smov 0   ;;  %s3271_s0 = inlined_call_operand.vmem [shape: f32[2,9,9,16], index: 0, kind: input, shape index: {}]   ;;  %s3272_s1 = inlined_call_operand.vmem [shape: bf16[4,16,128], index: 1, kind: input, shape index: {}]   ;;  %s3273_s2 = inlined_call_operand.vmem [shape: bf16[9,128,128], index: 2, kind: input, shape index: {}]   ;;  %s3274_s3 = inlined_call_operand.vmem [shape: f32[1,16], index: 3, kind: input, shape index: {}]   ;;  %s3275_s4 = inlined_call_operand.vmem [shape: f32[1,16], index: 4, kind: input, shape index: {}]   ;;  %s3276_s5 = inlined_call_operand.vmem [shape: f32[1,128], index: 5, kind: input, shape index: {}]   ;;  %s3277_s6 = inlined_call_operand.vmem [shape: f32[1,128], index: 6, kind: input, shape index: {}]   ;;  %s3278_s7 = inlined_call_operand.vmem [shape: f32[16,128], index: 7, kind: input, shape index: {}]   ;;  %s3279_s8 = inlined_call_operand.vmem [shape: f32[2,8,8,128], index: 8, kind: output, shape index: {}]  }
   0x1 LB: > { %s1956_s28 = sadd.s32 4294967295, %s2528_s27   ;;  %p1960_p0 = scmp.ge.s32.totalorder %s2528_s27, 1  ;;  %s2528_s27 = sphi %s2577_s27, %s18_s27  }
   0x2   : > { %p262_p1 = scmp.lt.s32.totalorder %s2528_s27, 3 }
   0x4   : > { %p263_p2 = pnand %p1960_p0, %p262_p1 }
   0x5   : > { %p296_p3 = scmp.lt.s32.totalorder (!%p263_p2), %s1956_s28, 1 }
   0x6   : > { %266 = sbr.rel (%p263_p2) target bundleno = 533 (0x215), region = 52 }
   0xb   : > { %v2430_v0 = vld [vmem:[%s3272_s1 + $0x8] sm:$0xff]  ;;  %v2429_v1 = vld [vmem:[%s3272_s1] sm:$0xff]  ;;  %v387_v2 = vlaneseq  ;;  %s3289_s28 = smov (!%p296_p3, %s1956_s28), 1  ;;  %v2431_v6 = vld [vmem:[%s3272_s1 + $0x10] sm:$0xff]  ;;  %vm2530_vm6 = vmmov 1   ;;  %vm445_vm9 = vcmask 130048  }
   0xc   : > { %2505 = vmatpush.bf16.msra.mxu2 %v2430_v0  ;;  %2506 = vmatpush.bf16.msra.mxu3 %v2429_v1  ;;  %v2596_v3 = vld [vmem:[%s3274_s3] ss:$0 sm:$0xff]  ;;  %v2432_v7 = vld [vmem:[%s3272_s1 + $0x18] sm:$0xff]  ;;  %s2507_s17 = smul.u32 144, %s3289_s28  ;;  %vm447_vm10 = vcmask 122880   ;;  %s2428_s15 = sshll.u32 %s3289_s28, 6 }
   0xd   : > { %v388_v4 = vshrl.u32 %v387_v2, 7  ;;  %v2598_v5 = vand.u32 127, %v387_v2  ;;  %519 = vmatpush.bf16.msra.mxu0 %v2430_v0  ;;  %566 = vmatpush.bf16.msra.mxu1 %v2429_v1  ;;  %v2618_v9 = vld [vmem:[%s3275_s4] ss:$0 sm:$0xff]  ;;  %s3234_s18 = scalar_lea.vmem %s3279_s8, %s2428_s15 }
   0xe   : > { %s2613_s20 = scalar_lea.vmem %s3271_s0, %s2507_s17 }
   0xf   : > { %v389_v8 = vadd.s32 8, %v388_v4  ;;  %vm393_vm0 = vcmp.ge.s32.totalorder %v2598_v5, 4  ;;  %vm394_vm1 = vcmp.lt.s32.totalorder %v2598_v5, 8  ;;  %vm396_vm2 = vcmp.ge.s32.totalorder %v2598_v5, 12  ;;  %v315_v11 = vld [vmem:[%s2613_s20 + $0x40] sm:$0xff]  ;;  %v317_v13 = vld [vmem:[%s2613_s20 + $0x50] sm:$0xff] }
  0x10   : > { %629 = vmatpush.bf16.msrb.mxu2 %v2431_v6  ;;  %vm395_vm3 = vmand %vm393_vm0, %vm394_vm1  ;;  %699 = vmatpush.bf16.msrb.mxu3 %v2432_v7  ;;  %v316_v12 = vld [vmem:[%s2613_s20 + $0x48] sm:$0x1]  ;;  %vm406_vm5 = vcmp.eq.s32.totalorder %v388_v4, 0  ;;  %v318_v14 = vld [vmem:[%s2613_s20 + $0x58] sm:$0x1]  ;;  %v338_v15 = vmul.f32 %v2596_v3, %v315_v11  ;;  %v340_v17 = vmul.f32 %v2596_v3, %v317_v13  ;;  %vm392_vm13 = vcmp.ge.s32.totalorder %v2598_v5, 8 }
  0x11   : > { %vm2620_vm4 = vmor %vm395_vm3, %vm396_vm2  ;;  %v339_v16 = vmul.f32 %v2596_v3, %v316_v12  ;;  %vm418_vm8 = vcmp.eq.s32.totalorder %v389_v8, 8  ;;  %v319_v18 = vld [vmem:[%s2613_s20 + $0x60] sm:$0xff]  ;;  %v341_v19 = vmul.f32 %v2596_v3, %v318_v14  ;;  %v320_v20 = vld [vmem:[%s2613_s20 + $0x68] sm:$0x1] }
  0x12   : > { %vm408_vm7 = vmxor %vm2620_vm4, %vm2530_vm6  ;;  %v321_v21 = vld [vmem:[%s2613_s20 + $0x70] sm:$0xff]  ;;  %v342_v22 = vmul.f32 %v2596_v3, %v319_v18  ;;  %v359_v23 = vadd.f32 %v2618_v9, %v338_v15  ;;  %v361_v25 = vadd.f32 %v2618_v9, %v340_v17  ;;  %v322_v27 = vld [vmem:[%s2613_s20 + $0x78] sm:$0x1]  ;;  %v343_v28 = vmul.f32 %v2596_v3, %v320_v20 }
  0x13   : > { %v360_v24 = vadd.f32 %v2618_v9, %v339_v16  ;;  %vm2643_vm11 = vmand %vm406_vm5, %vm408_vm7  ;;  %v362_v29 = vadd.f32 %v2618_v9, %v341_v19  ;;  %v344_v31 = vmul.f32 %v2596_v3, %v321_v21  ;;  %v345_v32 = vmul.f32 %v2596_v3, %v322_v27  ;;  %v307_v42 = vld [vmem:[%s2613_s20] sm:$0xff]  ;;  %v308_v43 = vld [vmem:[%s2613_s20 + $0x8] sm:$0x1] }
  0x14   : > { %vm2653_vm12 = vmand %vm418_vm8, %vm2620_vm4  ;;  %v363_v33 = vadd.f32 %v2618_v9, %v342_v22  ;;  %v377_v34 = vmax.f32 %v359_v23, 0.0  ;;  %v379_v36 = vmax.f32 %v361_v25, 0.0  ;;  %v364_v37 = vadd.f32 %v2618_v9, %v343_v28  ;;  %v309_v44 = vld [vmem:[%s2613_s20 + $0x10] sm:$0xff]  ;;  %v310_v49 = vld [vmem:[%s2613_s20 + $0x18] sm:$0x1] }
  0x15   : > { %v378_v35 = vmax.f32 %v360_v24, 0.0  ;;  %v380_v38 = vmax.f32 %v362_v29, 0.0  ;;  %v365_v39 = vadd.f32 %v2618_v9, %v344_v31  ;;  %v366_v40 = vadd.f32 %v2618_v9, %v345_v32  ;;  %v311_v53 = vld [vmem:[%s2613_s20 + $0x20] sm:$0xff]  ;;  %v312_v58 = vld [vmem:[%s2613_s20 + $0x28] sm:$0x1]  ;;  %vm2698_vm14 = vmxor %vm392_vm13, %vm2530_vm6 }
  0x16   : > { %v381_v41 = vmax.f32 %v363_v33, 0.0  ;;  %v435_v45 = vsel %vm2643_vm11, 0.0, %v377_v34  ;;  %v437_v47 = vsel %vm2643_vm11, 0.0, %v379_v36  ;;  %v382_v48 = vmax.f32 %v364_v37, 0.0  ;;  %vm411_vm15 = vmor %vm2698_vm14, %vm2643_vm11  ;;  %v313_v23 = vld [vmem:[%s2613_s20 + $0x30] sm:$0xff] }
  0x17   : > { %v436_v46 = vsel %vm2653_vm12, 0.0, %v378_v35  ;;  %v438_v50 = vsel %vm2653_vm12, 0.0, %v380_v38  ;;  %455 = vst.msk [vmem:[#allocation2 + $0x40] sm:$0xff] %vm445_vm9, %v435_v45  ;;  %v383_v51 = vmax.f32 %v365_v39, 0.0  ;;  %v384_v52 = vmax.f32 %v366_v40, 0.0  ;;  %vm422_vm0 = vmor %vm2698_vm14, %vm2653_vm12 }
  0x18   : > { %456 = vst.msk [vmem:[#allocation2 + $0x48] sm:$0x1] %vm447_vm10, %v436_v46  ;;  %v439_v54 = vsel %vm2643_vm11, 0.0, %v381_v41  ;;  %v330_v55 = vmul.f32 %v2596_v3, %v307_v42  ;;  %v331_v56 = vmul.f32 %v2596_v3, %v308_v43  ;;  %v332_v57 = vmul.f32 %v2596_v3, %v309_v44  ;;  %v314_v25 = vld [vmem:[%s2613_s20 + $0x38] sm:$0x1]  ;;  %vm415_vm1 = vmor %vm392_vm13, %vm2643_vm11 }
  0x19   : > { %457 = vst.msk [vmem:[#allocation2 + $0x50] sm:$0xff] %vm445_vm9, %v437_v47  ;;  %v440_v59 = vsel %vm2653_vm12, 0.0, %v382_v48  ;;  %v441_v60 = vsel %vm2643_vm11, 0.0, %v383_v51  ;;  %v333_v61 = vmul.f32 %v2596_v3, %v310_v49  ;;  %v334_v2 = vmul.f32 %v2596_v3, %v311_v53  ;;  %vm426_vm2 = vmor %vm392_vm13, %vm2653_vm12 }
  0x1a   : > { %458 = vst.msk [vmem:[#allocation2 + $0x58] sm:$0x1] %vm447_vm10, %v438_v50  ;;  %v351_v62 = vadd.f32 %v2618_v9, %v330_v55  ;;  %v352_v63 = vadd.f32 %v2618_v9, %v331_v56  ;;  %v353_v0 = vadd.f32 %v2618_v9, %v332_v57  ;;  %v442_v4 = vsel %vm2653_vm12, 0.0, %v384_v52 }
  0x1b   : > { %459 = vst.msk [vmem:[#allocation2 + $0x60] sm:$0xff] %vm445_vm9, %v439_v54  ;;  %v354_v6 = vadd.f32 %v2618_v9, %v333_v61  ;;  %v335_v7 = vmul.f32 %v2596_v3, %v312_v58  ;;  %v355_v12 = vadd.f32 %v2618_v9, %v334_v2  ;;  %v336_v27 = vmul.f32 %v2596_v3, %v313_v23  ;;  %v323_v61 = vld [vmem:[%s2613_s20 + $0x80] sm:$0xff]  ;;  %v2454_v23 = vld [vmem:[%s3273_s2 + $0xa8] sm:$0xff] }
  0x1c   : > { %460 = vst.msk [vmem:[#allocation2 + $0x68] sm:$0x1] %vm447_vm10, %v440_v59  ;;  %v369_v8 = vmax.f32 %v351_v62, 0.0  ;;  %v370_v10 = vmax.f32 %v352_v63, 0.0  ;;  %v371_v11 = vmax.f32 %v353_v0, 0.0  ;;  %v337_v33 = vmul.f32 %v2596_v3, %v314_v25 }
  0x1d   : > { %461 = vst.msk [vmem:[#allocation2 + $0x70] sm:$0xff] %vm445_vm9, %v441_v60  ;;  %v372_v13 = vmax.f32 %v354_v6, 0.0  ;;  %v356_v14 = vadd.f32 %v2618_v9, %v335_v7  ;;  %v373_v21 = vmax.f32 %v355_v12, 0.0  ;;  %v357_v35 = vadd.f32 %v2618_v9, %v336_v27  ;;  %v324_v62 = vld [vmem:[%s2613_s20 + $0x88] sm:$0x1] }
  0x1e   : > { %v2720_v15 = vld [vmem:[#allocation2 + $0x40] sm:$0xff]  ;;  %462 = vst.msk [vmem:[#allocation2 + $0x78] sm:$0x1] %vm447_vm10, %v442_v4  ;;  %v427_v16 = vsel %vm411_vm15, 0.0, %v369_v8  ;;  %v428_v17 = vsel %vm422_vm0, 0.0, %v370_v10  ;;  %v429_v18 = vsel %vm2643_vm11, 0.0, %v371_v11  ;;  %v358_v36 = vadd.f32 %v2618_v9, %v337_v33 }
  0x1f   : > { %v2725_v19 = vld [vmem:[#allocation2 + $0x41] sm:$0xff]  ;;  %v430_v20 = vsel %vm2653_vm12, 0.0, %v372_v13  ;;  %446 = vst.msk [vmem:[#allocation2] sm:$0xff] %vm445_vm9, %v427_v16  ;;  %v374_v22 = vmax.f32 %v356_v14, 0.0  ;;  %v431_v31 = vsel %vm2643_vm11, 0.0, %v373_v21  ;;  %v375_v37 = vmax.f32 %v357_v35, 0.0 }
  0x20   : > { %v2731_v24 = vld [vmem:[#allocation2 + $0x50] sm:$0xff]  ;;  %448 = vst.msk [vmem:[#allocation2 + $0x8] sm:$0x1] %vm447_vm10, %v428_v17  ;;  %v376_v38 = vmax.f32 %v358_v36, 0.0  ;;  %v346_v63 = vmul.f32 %v2596_v3, %v323_v61  ;;  %v347_v0 = vmul.f32 %v2596_v3, %v324_v62  ;;  %v2448_v13 = vld [vmem:[%s3273_s2 + $0x78] sm:$0xff]  ;;  %v2446_v17 = vld [vmem:[%s3273_s2 + $0x68] sm:$0xff] }
  0x21   : > { %v2736_v28 = vld [vmem:[#allocation2 + $0x51] sm:$0xff]  ;;  %v475_v29 = vpack.c.bf16 %v2731_v24, %v2720_v15  ;;  %449 = vst.msk [vmem:[#allocation2 + $0x10] sm:$0xff] %vm445_vm9, %v429_v18  ;;  %v432_v32 = vsel %vm2653_vm12, 0.0, %v374_v22  ;;  %v433_v40 = vsel %vm2643_vm11, 0.0, %v375_v37  ;;  %905 = vmatpush.bf16.msrb.mxu0 %v2448_v13  ;;  %v2438_v22 = vld [vmem:[%s3273_s2 + $0x28] sm:$0xff] }
  0x22   : > { %v489_v34 = vpack.c.bf16 %v2736_v28, %v2725_v19  ;;  %450 = vst.msk [vmem:[#allocation2 + $0x18] sm:$0x1] %vm447_vm10, %v430_v20  ;;  %v434_v42 = vsel %vm2653_vm12, 0.0, %v376_v38  ;;  %v471_v47 = vld [vmem:[#allocation2 + $0x60] sm:$0xff]  ;;  %v367_v1 = vadd.f32 %v2618_v9, %v346_v63  ;;  %v368_v2 = vadd.f32 %v2618_v9, %v347_v0  ;;  %v2447_v14 = vld [vmem:[%s3273_s2 + $0x70] sm:$0xff]  ;;  %v2456_v16 = vld [vmem:[%s3273_s2 + $0xb8] sm:$0xff] }
  0x23   : > { %1980 = vmatmul.msk.bf16.vlgmr.msra.gmra.mxu3 %vm445_vm9, %v475_v29  ;;  %451 = vst.msk [vmem:[#allocation2 + $0x20] sm:$0xff] %vm445_vm9, %v431_v31  ;;  %v485_v49 = vld [vmem:[#allocation2 + $0x61] sm:$0xff]  ;;  %v599_v30 = vpack.c.bf16 %v471_v47, %v2731_v24  ;;  %v2439_v18 = vld [vmem:[%s3273_s2 + $0x30] sm:$0xff]  ;;  %v2464_v21 = vld [vmem:[%s3273_s2 + $0xf8] sm:$0xff] }
  0x24   : > { %1972 = vmatmul.msk.bf16.vlgmr.msra.gmra.mxu2 %vm445_vm9, %v489_v34  ;;  %452 = vst.msk [vmem:[#allocation2 + $0x28] sm:$0x1] %vm447_vm10, %v432_v32  ;;  %v472_v48 = vld [vmem:[#allocation2 + $0x70] sm:$0xff]  ;;  %v385_v4 = vmax.f32 %v367_v1, 0.0  ;;  %v386_v6 = vmax.f32 %v368_v2, 0.0  ;;  %v669_v8 = vpack.c.bf16 %v485_v49, %v2736_v28  ;;  %v2445_v20 = vld [vmem:[%s3273_s2 + $0x60] sm:$0xff]  ;;  %1202 = vmatpush.bf16.msra.mxu3 %v2464_v21 }
  0x25   : > { %453 = vst.msk [vmem:[#allocation2 + $0x30] sm:$0xff] %vm445_vm9, %v433_v40  ;;  %v486_v50 = vld [vmem:[#allocation2 + $0x71] sm:$0xff]  ;;  %v476_v51 = vpack.c.bf16 %v472_v48, %v471_v47  ;;  %906 = vmatpush.bf16.msrb.mxu0 %v2447_v14  ;;  %1088 = vmatpush.bf16.msra.mxu2 %v2456_v16  ;;  %v2437_v28 = vld [vmem:[%s3273_s2 + $0x20] sm:$0xff]  ;;  %v2462_v35 = vld [vmem:[%s3273_s2 + $0xe8] sm:$0xff] }
  0x26   : > { %v465_v39 = vld [vmem:[#allocation2] sm:$0xff]  ;;  %454 = vst.msk [vmem:[#allocation2 + $0x38] sm:$0x1] %vm447_vm10, %v434_v42  ;;  %v490_v52 = vpack.c.bf16 %v486_v50, %v485_v49  ;;  %v443_v7 = vsel %vm415_vm1, 0.0, %v385_v4  ;;  %v444_v3 = vsel %vm426_vm2, 0.0, %v386_v6  ;;  %v2444_v24 = vld [vmem:[%s3273_s2 + $0x58] sm:$0xff] }
  0x27   : > { %v479_v41 = vld [vmem:[#allocation2 + $0x1] sm:$0xff]  ;;  %463 = vst.msk [vmem:[#allocation2 + $0x80] sm:$0xff] %vm445_vm9, %v443_v7  ;;  %v2463_v31 = vld [vmem:[%s3273_s2 + $0xf0] sm:$0xff]  ;;  %v2436_v33 = vld [vmem:[%s3273_s2 + $0x18] sm:$0xff] }
  0x28   : > { %v466_v43 = vld [vmem:[#allocation2 + $0x10] sm:$0xff]  ;;  %464 = vst.msk [vmem:[#allocation2 + $0x88] sm:$0x1] %vm447_vm10, %v444_v3  ;;  %v2453_v29 = vld [vmem:[%s3273_s2 + $0xa0] sm:$0xff]  ;;  %1203 = vmatpush.bf16.msra.mxu3 %v2463_v31  ;;  %v2452_v34 = vld [vmem:[%s3273_s2 + $0x98] sm:$0xff] }
  0x29   : > { %v480_v44 = vld [vmem:[#allocation2 + $0x11] sm:$0xff]  ;;  %v473_v45 = vpack.c.bf16 %v466_v43, %v465_v39  ;;  %907 = vmatpush.bf16.msrb.mxu0 %v2446_v17  ;;  %v2442_v36 = vld [vmem:[%s3273_s2 + $0x48] sm:$0xff]  ;;  %v2441_v42 = vld [vmem:[%s3273_s2 + $0x40] sm:$0xff] }
  0x2a   : > { %v487_v46 = vpack.c.bf16 %v480_v44, %v479_v41  ;;  %v590_v55 = vld [vmem:[#allocation2 + $0x20] sm:$0xff]  ;;  %v2443_v32 = vld [vmem:[%s3273_s2 + $0x50] sm:$0xff]  ;;  %v2470_v16 = vld [vmem:[%s3273_s2 + $0x128] sm:$0xff] }
  0x2b   : > { %1978 = vmatmul.msk.bf16.vlgmr.msra.gmra.mxu1 %vm445_vm9, %v473_v45  ;;  %v660_v56 = vld [vmem:[#allocation2 + $0x21] sm:$0xff]  ;;  %v597_v60 = vpack.c.bf16 %v590_v55, %v466_v43  ;;  %v2435_v39 = vld [vmem:[%s3273_s2 + $0x10] sm:$0xff]  ;;  %v2531_v43 = vmov 0.0   ;;  %v2938_v2 = vld [vmem:[%s3276_s5] ss:$0 sm:$0xff] }
  0x2c   : > { %1970 = vmatmul.msk.bf16.vlgmr.msra.gmra.mxu0 %vm445_vm9, %v487_v46  ;;  %v468_v53 = vld [vmem:[#allocation2 + $0x30] sm:$0xff]  ;;  %v667_v59 = vpack.c.bf16 %v660_v56, %v480_v44  ;;  %1204 = vmatpush.bf16.msra.mxu3 %v2462_v35  ;;  %v2461_v41 = vld [vmem:[%s3273_s2 + $0xe0] sm:$0xff]  ;;  %761 = vst [vmem:[#allocation3] sm:$0xff] %v2531_v43  ;;  %v2434_v44 = vld [vmem:[%s3273_s2 + $0x8] sm:$0xff] }
  0x2d   : > { %v482_v54 = vld [vmem:[#allocation2 + $0x31] sm:$0xff]  ;;  %v474_v57 = vpack.c.bf16 %v468_v53, %v590_v55  ;;  %v598_v26 = vpack.c.bf16 %v2720_v15, %v468_v53  ;;  %908 = vmatpush.bf16.msrb.mxu0 %v2445_v20  ;;  %762 = vst [vmem:[#allocation3 + $0x8] sm:$0xff] %v2531_v43  ;;  %v2450_v45 = vld [vmem:[%s3273_s2 + $0x88] sm:$0xff]  ;;  %v2433_v49 = vld [vmem:[%s3273_s2] sm:$0xff] }
  0x2e   : > { %v488_v58 = vpack.c.bf16 %v482_v54, %v660_v56  ;;  %v668_v9 = vpack.c.bf16 %v2725_v19, %v482_v54  ;;  %v596_v10 = vld [vmem:[#allocation2 + $0x80] sm:$0xff]  ;;  %v2440_v15 = vld [vmem:[%s3273_s2 + $0x38] sm:$0xff]  ;;  %v2455_v19 = vld [vmem:[%s3273_s2 + $0xb0] sm:$0xff]  ;;  %763 = vst [vmem:[#allocation3 + $0x10] sm:$0xff] %v2531_v43 }
  0x2f   : > { %v666_v5 = vld [vmem:[#allocation2 + $0x81] sm:$0xff]  ;;  %v600_v12 = vpack.c.bf16 %v596_v10, %v472_v48  ;;  %982 = vmatpush.bf16.msrb.mxu1 %v2440_v15  ;;  %1089 = vmatpush.bf16.msra.mxu2 %v2455_v19  ;;  %v2451_v40 = vld [vmem:[%s3273_s2 + $0x90] sm:$0xff]  ;;  %v2460_v46 = vld [vmem:[%s3273_s2 + $0xd8] sm:$0xff]  ;;  %764 = vst [vmem:[#allocation3 + $0x18] sm:$0xff] %v2531_v43 }
  0x30   : > { %v670_v11 = vpack.c.bf16 %v666_v5, %v486_v50  ;;  %1205 = vmatpush.bf16.msra.mxu3 %v2461_v41  ;;  %766 = vst [vmem:[#allocation3 + $0x28] sm:$0xff] %v2531_v43  ;;  %v2449_v50 = vld [vmem:[%s3273_s2 + $0x80] sm:$0xff]  ;;  %v2471_v7 = vld [vmem:[%s3273_s2 + $0x130] sm:$0xff]  ;;  %v2478_v17 = vld [vmem:[%s3273_s2 + $0x168] sm:$0xff] }
  0x31   : > { %909 = vmatpush.bf16.msrb.mxu0 %v2444_v24  ;;  %767 = vst [vmem:[#allocation3 + $0x30] sm:$0xff] %v2531_v43  ;;  %v2943_v6 = vld [vmem:[%s3277_s6] ss:$0 sm:$0xff]  ;;  %v2479_v3 = vld [vmem:[%s3273_s2 + $0x170] sm:$0xff] }
  0x32   : > { %769 = vst [vmem:[#allocation3 + $0x40] sm:$0xff] %v2531_v43 }
  0x33   : > { %1981 = vmatmul.msk.bf16.gmra.mxu3 %vm445_vm9, %v476_v51  ;;  %983 = vmatpush.bf16.msrb.mxu1 %v2439_v18  ;;  %v2459_v51 = vld [vmem:[%s3273_s2 + $0xd0] sm:$0xff]  ;;  %770 = vst [vmem:[#allocation3 + $0x48] sm:$0xff] %v2531_v43 }
  0x34   : > { %1973 = vmatmul.msk.bf16.gmra.mxu2 %vm445_vm9, %v490_v52  ;;  %1206 = vmatpush.bf16.msra.mxu3 %v2460_v46  ;;  %772 = vst [vmem:[#allocation3 + $0x58] sm:$0xff] %v2531_v43  ;;  %v2458_v52 = vld [vmem:[%s3273_s2 + $0xc8] sm:$0xff] }
  0x35   : > { %1090 = vmatpush.bf16.msra.mxu2 %v2454_v23  ;;  %910 = vmatpush.bf16.msrb.mxu0 %v2443_v32  ;;  %773 = vst [vmem:[#allocation3 + $0x60] sm:$0xff] %v2531_v43  ;;  %v800_v23 = vld [vmem:[#allocation3 + $0x7] sm:$0xff] }
  0x36   : > { %775 = vst [vmem:[#allocation3 + $0x70] sm:$0xff] %v2531_v43  ;;  %v1011_v24 = vld [vmem:[#allocation3 + $0x9] sm:$0xff] }
  0x37   : > { %984 = vmatpush.bf16.msrb.mxu1 %v2438_v22  ;;  %776 = vst [vmem:[#allocation3 + $0x78] sm:$0xff] %v2531_v43 }
  0x38   : > { %1207 = vmatpush.bf16.msra.mxu3 %v2459_v51  ;;  %778 = vst [vmem:[#allocation3 + $0x88] sm:$0xff] %v2531_v43 }
  0x39   : > { %1091 = vmatpush.bf16.msra.mxu2 %v2453_v29  ;;  %911 = vmatpush.bf16.msrb.mxu0 %v2442_v36  ;;  %779 = vst [vmem:[#allocation3 + $0x90] sm:$0xff] %v2531_v43  ;;  %v2469_v36 = vld [vmem:[%s3273_s2 + $0x120] sm:$0xff] }
  0x3a   : > { %781 = vst [vmem:[#allocation3 + $0xa0] sm:$0xff] %v2531_v43 }
  0x3b   : > { %1979 = vmatmul.msk.bf16.gmra.mxu1 %vm445_vm9, %v474_v57  ;;  %v2457_v57 = vld [vmem:[%s3273_s2 + $0xc0] sm:$0xff]  ;;  %782 = vst [vmem:[#allocation3 + $0xa8] sm:$0xff] %v2531_v43 }
  0x3c   : > { %1971 = vmatmul.msk.bf16.gmra.mxu0 %vm445_vm9, %v488_v58  ;;  %985 = vmatpush.bf16.msrb.mxu1 %v2437_v28  ;;  %784 = vst [vmem:[#allocation3 + $0xb8] sm:$0xff] %v2531_v43  ;;  %v2472_v58 = vld [vmem:[%s3273_s2 + $0x138] sm:$0xff] }
  0x3d   : > { %1092 = vmatpush.bf16.msra.mxu2 %v2452_v34  ;;  %912 = vmatpush.bf16.msrb.mxu0 %v2441_v42  ;;  %785 = vst [vmem:[#allocation3 + $0xc0] sm:$0xff] %v2531_v43  ;;  %v2488_v42 = vld [vmem:[%s3273_s2 + $0x1b8] sm:$0xff] }
  0x3e   : > { %1208 = vmatpush.bf16.msra.mxu3 %v2458_v52  ;;  %787 = vst [vmem:[#allocation3 + $0xd0] sm:$0xff] %v2531_v43 }
  0x3f   : > { %788 = vst [vmem:[#allocation3 + $0xd8] sm:$0xff] %v2531_v43 }
  0x40   : > { %986 = vmatpush.bf16.msrb.mxu1 %v2436_v33  ;;  %789 = vst [vmem:[#allocation3 + $0xe0] sm:$0xff] %v2531_v43 }
  0x41   : > { %1093 = vmatpush.bf16.msra.mxu2 %v2451_v40  ;;  %1316 = vmatpush.bf16.msra.mxu0 %v2472_v58  ;;  %790 = vst [vmem:[#allocation3 + $0xe8] sm:$0xff] %v2531_v43 }
  0x42   : > { %1209 = vmatpush.bf16.msra.mxu3 %v2457_v57 }
  0x43   : > { %1998 = vmatmul.msk.bf16.vlgmr.msrb.gmra.mxu3 %vm445_vm9, %v667_v59  ;;  %v2480_v59 = vld [vmem:[%s3273_s2 + $0x178] sm:$0xff] }
  0x44   : > { %1988 = vmatmul.msk.bf16.vlgmr.msrb.gmra.mxu2 %vm445_vm9, %v597_v60  ;;  %987 = vmatpush.bf16.msrb.mxu1 %v2435_v39  ;;  %v2477_v39 = vld [vmem:[%s3273_s2 + $0x160] sm:$0xff] }
  0x45   : > { %1094 = vmatpush.bf16.msra.mxu2 %v2450_v45  ;;  %1317 = vmatpush.bf16.msra.mxu0 %v2471_v7 }
  0x48   : > { %988 = vmatpush.bf16.msrb.mxu1 %v2434_v44 }
  0x49   : > { %1095 = vmatpush.bf16.msra.mxu2 %v2449_v50  ;;  %1318 = vmatpush.bf16.msra.mxu0 %v2470_v16  ;;  %v2487_v50 = vld [vmem:[%s3273_s2 + $0x1b0] sm:$0xff]  ;;  %v2484_v16 = vld [vmem:[%s3273_s2 + $0x198] sm:$0xff] }
  0x4c   : > { %989 = vmatpush.bf16.msrb.mxu1 %v2433_v49 }
  0x4d   : > { %1319 = vmatpush.bf16.msra.mxu0 %v2469_v36  ;;  %1545 = vmatpush.bf16.msrb.mxu2 %v2488_v42  ;;  %v2473_v42 = vld [vmem:[%s3273_s2 + $0x140] sm:$0xff] }
  0x50   : > { %1430 = vmatpush.bf16.msra.mxu1 %v2480_v59  ;;  %v2468_v59 = vld [vmem:[%s3273_s2 + $0x118] sm:$0xff] }
  0x51   : > { %1546 = vmatpush.bf16.msrb.mxu2 %v2487_v50  ;;  %1320 = vmatpush.bf16.msra.mxu0 %v2468_v59 }
  0x53   : > { %1999 = vmatmul.msk.bf16.gmra.mxu3 %vm445_vm9, %v668_v9 }
  0x54   : > { %1989 = vmatmul.msk.bf16.gmra.mxu2 %vm445_vm9, %v598_v26  ;;  %1431 = vmatpush.bf16.msra.mxu1 %v2479_v3  ;;  %v2467_v3 = vld [vmem:[%s3273_s2 + $0x110] sm:$0xff] }
  0x55   : > { %1321 = vmatpush.bf16.msra.mxu0 %v2467_v3 }
  0x58   : > { %1432 = vmatpush.bf16.msra.mxu1 %v2478_v17  ;;  %v2494_v17 = vld [vmem:[%s3273_s2 + $0x1e8] sm:$0xff] }
  0x5c   : > { %1433 = vmatpush.bf16.msra.mxu1 %v2477_v39  ;;  %v2482_v39 = vld [vmem:[%s3273_s2 + $0x188] sm:$0xff] }
  0x63   : > { %2000 = vmatmul.msk.bf16.gmra.mxu3 %vm445_vm9, %v669_v8 }
  0x64   : > { %1990 = vmatmul.msk.bf16.gmra.mxu2 %vm445_vm9, %v599_v30 }
  0x73   : > { %2001 = vmatmul.msk.bf16.gmra.mxu3 %vm445_vm9, %v670_v11 }
  0x74   : > { %1991 = vmatmul.msk.bf16.gmra.mxu2 %vm445_vm9, %v600_v12 }
  0xa6   : > { %v2831_v25 = vpop.f32.mrf.mxu3 }
  0xa7   : > { %v2833_v27 = vpop.f32.mrf.mxu2 }
  0xa8   : > { %v568_v53 = vpop.f32.mrf.mxu1 }
  0xa9   : > { %v521_v54 = vpop.f32.mrf.mxu0 }
  0xaa   : > { %v569_v60 = vadd.f32 %v568_v53, %v521_v54 }
  0xae   : > { %v2859_v37 = vpop.f32.mrf.mxu3 }
  0xaf   : > { %v2861_v38 = vpop.f32.mrf.mxu2 }
  0xb0   : > { %v570_v61 = vpop.f32.mrf.mxu1 }
  0xb1   : > { %v523_v63 = vpop.f32.mrf.mxu0 }
  0xb2   : > { %v571_v26 = vadd.f32 %v570_v61, %v523_v63  ;;  %v2486_v61 = vld [vmem:[%s3273_s2 + $0x1a8] sm:$0xff] }
  0xb3   : > { %1547 = vmatpush.bf16.msrb.mxu2 %v2486_v61 }
  0xb6   : > { %v2889_v47 = vpop.f32.mrf.mxu3 }
  0xb7   : > { %v2892_v48 = vpop.f32.mrf.mxu2 }
  0xb8   : > { %v573_v13 = vpop.f32.mrf.mxu1 }
  0xb9   : > { %v526_v12 = vpop.f32.mrf.mxu0 }
  0xba   : > { %v574_v18 = vadd.f32 %v573_v13, %v526_v12 }
  0xbe   : > { %v2913_v55 = vpop.f32.mrf.mxu3 }
  0xbf   : > { %v2916_v56 = vpop.f32.mrf.mxu2 }
  0xc0   : > { %v575_v41 = vpop.f32.mrf.mxu1 }
  0xc1   : > { %v528_v40 = vpop.f32.mrf.mxu0 }
  0xc2   : > { %v576_v44 = vadd.f32 %v575_v41, %v528_v40  ;;  %v2492_v40 = vld [vmem:[%s3273_s2 + $0x1d8] sm:$0xff] }
  0xc6   : > { %v701_v62 = vpop.f32.mrf.mxu3 }
  0xc7   : > { %v631_v0 = vpop.f32.mrf.mxu2 }
  0xc8   : > { %v651_v1 = vadd.f32 %v631_v0, %v569_v60  ;;  %v2476_v60 = vld [vmem:[%s3273_s2 + $0x158] sm:$0xff]  ;;  %v579_v0 = vadd.f32 %v2831_v25, %v2833_v27 }
  0xc9   : > { %1434 = vmatpush.bf16.msra.mxu1 %v2476_v60 }
  0xca   : > { %v721_v4 = vadd.f32 %v701_v62, %v651_v1  ;;  %v2496_v62 = vld [vmem:[%s3273_s2 + $0x1f8] sm:$0xff] }
  0xcb   : > { %1659 = vmatpush.bf16.msrb.mxu3 %v2496_v62  ;;  %v2504_v62 = vld [vmem:[%s3273_s2 + $0x238] sm:$0xff] }
  0xcc   : > { %v733_v9 = vmul.f32 %v2938_v2, %v721_v4 }
  0xce   : > { %v745_v8 = vadd.f32 %v2943_v6, %v733_v9  ;;  %v703_v30 = vpop.f32.mrf.mxu3  ;;  %v2485_v9 = vld [vmem:[%s3273_s2 + $0x1a0] sm:$0xff] }
  0xcf   : > { %v633_v5 = vpop.f32.mrf.mxu2  ;;  %1548 = vmatpush.bf16.msrb.mxu2 %v2485_v9 }
  0xd0   : > { %v2953_v10 = vmax.f32 %v745_v8, 0.0  ;;  %v652_v11 = vadd.f32 %v633_v5, %v571_v26  ;;  %v2495_v26 = vld [vmem:[%s3273_s2 + $0x1f0] sm:$0xff] }
  0xd1   : > { %1660 = vmatpush.bf16.msrb.mxu3 %v2495_v26 }
  0xd2   : > { %792 = vst [vmem:[#allocation3 + $0x20] sm:$0xff] %v2953_v10  ;;  %v722_v14 = vadd.f32 %v703_v30, %v652_v11  ;;  %v836_v15 = vpack.c.bf16 %v2953_v10, %v2531_v43 }
  0xd3   : > { %1549 = vmatpush.bf16.msrb.mxu2 %v2484_v16 }
  0xd4   : > { %v734_v19 = vmul.f32 %v2938_v2, %v722_v14  ;;  %913 = vmatmul.bf16.vlgmr.msrb.gmra.mxu0 %v836_v15  ;;  %v2475_v14 = vld [vmem:[%s3273_s2 + $0x150] sm:$0xff]  ;;  %v2466_v15 = vld [vmem:[%s3273_s2 + $0x108] sm:$0xff] }
  0xd5   : > { %1435 = vmatpush.bf16.msra.mxu1 %v2475_v14  ;;  %1322 = vmatpush.bf16.msra.mxu0 %v2466_v15 }
  0xd6   : > { %v746_v20 = vadd.f32 %v2943_v6, %v734_v19  ;;  %v706_v21 = vpop.f32.mrf.mxu3  ;;  %v2474_v19 = vld [vmem:[%s3273_s2 + $0x148] sm:$0xff]  ;;  %1661 = vmatpush.bf16.msrb.mxu3 %v2494_v17 }
  0xd7   : > { %v636_v22 = vpop.f32.mrf.mxu2 }
  0xd8   : > { %v2966_v28 = vmax.f32 %v746_v20, 0.0  ;;  %v653_v29 = vadd.f32 %v636_v22, %v574_v18  ;;  %v581_v20 = vadd.f32 %v2859_v37, %v2861_v38 }
  0xd9   : > { %v801_v31 = vld [vmem:[#allocation3 + $0x1f] sm:$0xff]  ;;  %1436 = vmatpush.bf16.msra.mxu1 %v2474_v19 }
  0xda   : > { %v2968_v32 = vld [vmem:[#allocation3 + $0x21] sm:$0xff]  ;;  %793 = vst [vmem:[#allocation3 + $0x38] sm:$0xff] %v2966_v28  ;;  %v723_v33 = vadd.f32 %v706_v21, %v653_v29  ;;  %v808_v34 = vpack.c.bf16 %v801_v31, %v800_v23 }
  0xdb   : > { %v1019_v35 = vpack.c.bf16 %v2968_v32, %v1011_v24  ;;  %v2483_v23 = vld [vmem:[%s3273_s2 + $0x190] sm:$0xff]  ;;  %v2493_v24 = vld [vmem:[%s3273_s2 + $0x1e0] sm:$0xff] }
  0xdc   : > { %v735_v43 = vmul.f32 %v2938_v2, %v723_v33  ;;  %990 = vmatmul.bf16.vlgmr.msrb.gmra.mxu1 %v808_v34  ;;  %1550 = vmatpush.bf16.msrb.mxu2 %v2483_v23 }
  0xdd   : > { %1096 = vmatmul.bf16.vlgmr.msra.gmra.mxu2 %v1019_v35  ;;  %1662 = vmatpush.bf16.msrb.mxu3 %v2493_v24 }
  0xde   : > { %v747_v45 = vadd.f32 %v2943_v6, %v735_v43  ;;  %v708_v46 = vpop.f32.mrf.mxu3  ;;  %v584_v43 = vadd.f32 %v2889_v47, %v2892_v48  ;;  %1437 = vmatpush.bf16.msra.mxu1 %v2473_v42 }
  0xdf   : > { %v638_v49 = vpop.f32.mrf.mxu2 }
  0xe0   : > { %v2986_v51 = vmax.f32 %v747_v45, 0.0  ;;  %v654_v52 = vadd.f32 %v638_v49, %v576_v44  ;;  %1551 = vmatpush.bf16.msrb.mxu2 %v2482_v39  ;;  %v2481_v45 = vld [vmem:[%s3273_s2 + $0x180] sm:$0xff] }
  0xe1   : > { %v1126_v53 = vld [vmem:[#allocation3 + $0x37] sm:$0xff]  ;;  %1663 = vmatpush.bf16.msrb.mxu3 %v2492_v40 }
  0xe2   : > { %794 = vst [vmem:[#allocation3 + $0x50] sm:$0xff] %v2986_v51  ;;  %v724_v54 = vadd.f32 %v708_v46, %v654_v52  ;;  %v1133_v57 = vpack.c.bf16 %v1126_v53, %v801_v31  ;;  %v2991_v58 = vpack.c.bf16 %v2986_v51, %v2966_v28  ;;  %v3021_v30 = vld [vmem:[#allocation3 + $0x39] sm:$0xff]  ;;  %v2465_v31 = vld [vmem:[%s3273_s2 + $0x100] sm:$0xff] }
  0xe3   : > { %1323 = vmatpush.bf16.msra.mxu0 %v2465_v31  ;;  %v2491_v46 = vld [vmem:[%s3273_s2 + $0x1d0] sm:$0xff]  ;;  %v1361_v31 = vpack.c.bf16 %v3021_v30, %v2968_v32 }
  0xe4   : > { %v736_v63 = vmul.f32 %v2938_v2, %v724_v54  ;;  %1210 = vmatmul.bf16.vlgmr.msra.gmra.mxu3 %v1133_v57  ;;  %918 = vmatmul.bf16.gmra.mxu0 %v2991_v58  ;;  %v2499_v32 = vld [vmem:[%s3273_s2 + $0x210] sm:$0xff] }
  0xe5   : > { %1552 = vmatpush.bf16.msrb.mxu2 %v2481_v45  ;;  %1664 = vmatpush.bf16.msrb.mxu3 %v2491_v46  ;;  %v1811_v45 = vld [vmem:[#allocation2 + $0x10] sm:$0xff] }
  0xe6   : > { %v748_v1 = vadd.f32 %v2943_v6, %v736_v63  ;;  %v711_v4 = vpop.f32.mrf.mxu3  ;;  %v2490_v63 = vld [vmem:[%s3273_s2 + $0x1c8] sm:$0xff] }
  0xe7   : > { %v641_v7 = vpop.f32.mrf.mxu2  ;;  %1773 = vmatpush.bf16.msrb.mxu0 %v2504_v62 }
  0xe8   : > { %v3019_v8 = vmax.f32 %v748_v1, 0.0  ;;  %v655_v25 = vadd.f32 %v641_v7, %v579_v0  ;;  %v1819_v0 = vld [vmem:[%s3278_s7 + $0x8] sm:$0xff]  ;;  %v586_v1 = vadd.f32 %v2913_v55, %v2916_v56  ;;  %v2489_v7 = vld [vmem:[%s3273_s2 + $0x1c0] sm:$0xff]  ;;  %v2503_v56 = vld [vmem:[%s3273_s2 + $0x230] sm:$0xff] }
  0xe9   : > { %v803_v27 = vld [vmem:[#allocation3 + $0x4f] sm:$0xff]  ;;  %1858 = vmatpush.msrb.mxu1 %v1819_v0  ;;  %1665 = vmatpush.bf16.msrb.mxu3 %v2490_v63 }
  0xea   : > { %v3023_v5 = vld [vmem:[#allocation3 + $0x51] sm:$0xff]  ;;  %795 = vst [vmem:[#allocation3 + $0x68] sm:$0xff] %v3019_v8  ;;  %v725_v11 = vadd.f32 %v711_v4, %v655_v25  ;;  %v3026_v12 = vpack.c.bf16 %v803_v27, %v1126_v53 }
  0xeb   : > { %v3030_v13 = vpack.c.bf16 %v3023_v5, %v3021_v30  ;;  %1774 = vmatpush.bf16.msrb.mxu0 %v2503_v56 }
  0xec   : > { %v737_v18 = vmul.f32 %v2938_v2, %v725_v11  ;;  %995 = vmatmul.bf16.gmra.mxu1 %v3026_v12 }
  0xed   : > { %1101 = vmatmul.bf16.gmra.mxu2 %v3030_v13  ;;  %1666 = vmatpush.bf16.msrb.mxu3 %v2489_v7  ;;  %v1703_v7 = vld [vmem:[#allocation3 + $0xe1] sm:$0xff] }
  0xee   : > { %v749_v21 = vadd.f32 %v2943_v6, %v737_v18  ;;  %v713_v22 = vpop.f32.mrf.mxu3 }
  0xef   : > { %v643_v29 = vpop.f32.mrf.mxu2 }
  0xf0   : > { %v3062_v33 = vmax.f32 %v749_v21, 0.0  ;;  %v656_v37 = vadd.f32 %v643_v29, %v581_v20  ;;  %v2501_v29 = vld [vmem:[%s3273_s2 + $0x220] sm:$0xff] }
  0xf1   : > { %v1128_v38 = vld [vmem:[#allocation3 + $0x67] sm:$0xff] }
  0xf2   : > { %796 = vst [vmem:[#allocation3 + $0x80] sm:$0xff] %v3062_v33  ;;  %v726_v34 = vadd.f32 %v713_v22, %v656_v37  ;;  %v1134_v35 = vpack.c.bf16 %v1128_v38, %v803_v27  ;;  %v3067_v36 = vpack.c.bf16 %v3062_v33, %v3019_v8  ;;  %v3091_v47 = vld [vmem:[#allocation3 + $0x69] sm:$0xff] }
  0xf3   : > { %v2500_v37 = vld [vmem:[%s3273_s2 + $0x218] sm:$0xff]  ;;  %v1362_v30 = vpack.c.bf16 %v3091_v47, %v3023_v5 }
  0xf4   : > { %v738_v41 = vmul.f32 %v2938_v2, %v726_v34  ;;  %1215 = vmatmul.bf16.gmra.mxu3 %v1134_v35  ;;  %923 = vmatmul.bf16.gmra.mxu0 %v3067_v36  ;;  %v1475_v34 = vld [vmem:[#allocation3 + $0xdf] sm:$0xff] }
  0xf6   : > { %v750_v44 = vadd.f32 %v2943_v6, %v738_v41  ;;  %v716_v50 = vpop.f32.mrf.mxu3 }
  0xf7   : > { %v646_v49 = vpop.f32.mrf.mxu2 }
  0xf8   : > { %v3089_v52 = vmax.f32 %v750_v44, 0.0  ;;  %v657_v53 = vadd.f32 %v646_v49, %v584_v43 }
  0xf9   : > { %v805_v54 = vld [vmem:[#allocation3 + $0x7f] sm:$0xff] }
  0xfa   : > { %v3093_v48 = vld [vmem:[#allocation3 + $0x81] sm:$0xff]  ;;  %797 = vst [vmem:[#allocation3 + $0x98] sm:$0xff] %v3089_v52  ;;  %v727_v57 = vadd.f32 %v716_v50, %v657_v53  ;;  %v3096_v59 = vpack.c.bf16 %v805_v54, %v1128_v38 }
  0xfb   : > { %v3100_v60 = vpack.c.bf16 %v3093_v48, %v3091_v47  ;;  %v1813_v47 = vld [vmem:[#allocation2 + $0x30] sm:$0xff] }
  0xfc   : > { %v739_v61 = vmul.f32 %v2938_v2, %v727_v57  ;;  %1000 = vmatmul.bf16.gmra.mxu1 %v3096_v59 }
  0xfd   : > { %1106 = vmatmul.bf16.gmra.mxu2 %v3100_v60 }
  0xfe   : > { %v751_v4 = vadd.f32 %v2943_v6, %v739_v61  ;;  %v718_v25 = vpop.f32.mrf.mxu3 }
  0xff   : > { %v648_v3 = vpop.f32.mrf.mxu2 }
 0x100   : > { %v759_v9 = vmax.f32 %v751_v4, 0.0  ;;  %v658_v26 = vadd.f32 %v648_v3, %v586_v1 }
 0x101   : > { %v1130_v27 = vld [vmem:[#allocation3 + $0x97] sm:$0xff] }
 0x102   : > { %798 = vst [vmem:[#allocation3 + $0xb0] sm:$0xff] %v759_v9  ;;  %v728_v11 = vadd.f32 %v718_v25, %v658_v26  ;;  %v1135_v14 = vpack.c.bf16 %v1130_v27, %v805_v54  ;;  %v839_v15 = vpack.c.bf16 %v759_v9, %v3089_v52  ;;  %v1017_v19 = vld [vmem:[#allocation3 + $0x99] sm:$0xff] }
 0x104   : > { %v740_v55 = vmul.f32 %v2938_v2, %v728_v11  ;;  %1220 = vmatmul.bf16.gmra.mxu3 %v1135_v14  ;;  %928 = vmatmul.bf16.gmra.mxu0 %v839_v15  ;;  %v2502_v2 = vld [vmem:[%s3273_s2 + $0x228] sm:$0xff] }
 0x105   : > { %1775 = vmatpush.bf16.msrb.mxu0 %v2502_v2 }
 0x106   : > { %v752_v16 = vadd.f32 %v2943_v6, %v740_v55  ;;  %v1247_v6 = vpack.c.bf16 %v2966_v28, %v2953_v10  ;;  %v1818_v10 = vld [vmem:[%s3278_s7] sm:$0xff]  ;;  %v1248_v28 = vpack.c.bf16 %v3019_v8, %v2986_v51  ;;  %v1363_v8 = vpack.c.bf16 %v1017_v19, %v3093_v48 }
 0x107   : > { %1859 = vmatpush.msrb.mxu1 %v1818_v10  ;;  %v2497_v51 = vld [vmem:[%s3273_s2 + $0x200] sm:$0xff] }
 0x108   : > { %v760_v17 = vmax.f32 %v752_v16, 0.0  ;;  %v1816_v55 = vld [vmem:[#allocation2 + $0x60] sm:$0xff] }
 0x109   : > { %v807_v18 = vld [vmem:[#allocation3 + $0xaf] sm:$0xff]  ;;  %1776 = vmatpush.bf16.msrb.mxu0 %v2501_v29 }
 0x10a   : > { %v1018_v20 = vld [vmem:[#allocation3 + $0xb1] sm:$0xff]  ;;  %799 = vst [vmem:[#allocation3 + $0xc8] sm:$0xff] %v760_v17  ;;  %v811_v21 = vpack.c.bf16 %v807_v18, %v1130_v27  ;;  %v1250_v5 = vpack.c.bf16 %v760_v17, %v759_v9  ;;  %v1593_v41 = vpack.c.bf16 0.0, %v760_v17  ;;  %v1815_v9 = vld [vmem:[#allocation2 + $0x50] sm:$0xff] }
 0x10b   : > { %v3126_v22 = vpack.c.bf16 %v1018_v20, %v1017_v19  ;;  %v1817_v19 = vld [vmem:[#allocation2 + $0x70] sm:$0xff] }
 0x10c   : > { %1005 = vmatmul.bf16.gmra.mxu1 %v811_v21 }
 0x10d   : > { %1111 = vmatmul.bf16.gmra.mxu2 %v3126_v22  ;;  %1777 = vmatpush.bf16.msrb.mxu0 %v2500_v37 }
 0x111   : > { %v1132_v23 = vld [vmem:[#allocation3 + $0xc7] sm:$0xff]  ;;  %1778 = vmatpush.bf16.msrb.mxu0 %v2499_v32 }
 0x112   : > { %v1136_v24 = vpack.c.bf16 %v1132_v23, %v807_v18  ;;  %v1360_v38 = vld [vmem:[#allocation3 + $0xc9] sm:$0xff]  ;;  %v1479_v39 = vpack.c.bf16 %v1475_v34, %v1132_v23 }
 0x113   : > { %v1364_v35 = vpack.c.bf16 %v1360_v38, %v1018_v20  ;;  %v1707_v27 = vpack.c.bf16 %v1703_v7, %v1360_v38 }
 0x114   : > { %1225 = vmatmul.bf16.gmra.mxu3 %v1136_v24  ;;  %1324 = vmatmul.bf16.vlgmr.msra.gmra.mxu0 %v1247_v6 }
 0x11c   : > { %1438 = vmatmul.bf16.vlgmr.msra.gmra.mxu1 %v1361_v31 }
 0x11d   : > { %1553 = vmatmul.bf16.vlgmr.msrb.gmra.mxu2 %v3026_v12  ;;  %v2498_v12 = vld [vmem:[%s3273_s2 + $0x208] sm:$0xff] }
 0x11e   : > { %1779 = vmatpush.bf16.msrb.mxu0 %v2498_v12 }
 0x122   : > { %1780 = vmatpush.bf16.msrb.mxu0 %v2497_v51 }
 0x124   : > { %1667 = vmatmul.bf16.vlgmr.msrb.gmra.mxu3 %v2991_v58  ;;  %1329 = vmatmul.bf16.gmra.mxu0 %v1248_v28  ;;  %v1249_v58 = vpack.c.bf16 %v3089_v52, %v3062_v33  ;;  %v1812_v52 = vld [vmem:[#allocation2 + $0x20] sm:$0xff] }
 0x12c   : > { %1443 = vmatmul.bf16.gmra.mxu1 %v1362_v30 }
 0x12d   : > { %1558 = vmatmul.bf16.gmra.mxu2 %v3096_v59 }
 0x134   : > { %1672 = vmatmul.bf16.gmra.mxu3 %v3067_v36  ;;  %1334 = vmatmul.bf16.gmra.mxu0 %v1249_v58  ;;  %v1810_v36 = vld [vmem:[#allocation2] sm:$0xff] }
 0x13c   : > { %1448 = vmatmul.bf16.gmra.mxu1 %v1363_v8 }
 0x13d   : > { %1563 = vmatmul.bf16.gmra.mxu2 %v811_v21 }
 0x144   : > { %1677 = vmatmul.bf16.gmra.mxu3 %v839_v15  ;;  %1339 = vmatmul.bf16.gmra.mxu0 %v1250_v5 }
 0x14c   : > { %1453 = vmatmul.bf16.gmra.mxu1 %v1364_v35 }
 0x14d   : > { %1568 = vmatmul.bf16.gmra.mxu2 %v1479_v39 }
 0x151   : > { %v914_v40 = vpop.f32.mrf.mxu0 }
 0x154   : > { %1682 = vmatmul.bf16.gmra.mxu3 %v1593_v41  ;;  %1781 = vmatmul.bf16.vlgmr.msrb.gmra.mxu0 %v3030_v13 }
 0x159   : > { %v991_v33 = vpop.f32.mrf.mxu1  ;;  %v916_v42 = vpop.f32.mrf.mxu0 }
 0x15a   : > { %v3166_v43 = vadd.f32 %v991_v33, %v914_v40 }
 0x15c   : > { %2418 = vmatmul.msk.f32.vlgmr.msrb.gmra.mxu1 %vm445_vm9, %v1810_v36 }
 0x160   : > { %v1097_v57 = vpop.f32.mrf.mxu2 }
 0x161   : > { %v993_v44 = vpop.f32.mrf.mxu1  ;;  %v919_v46 = vpop.f32.mrf.mxu0 }
 0x162   : > { %v3169_v49 = vadd.f32 %v993_v44, %v916_v42  ;;  %v1117_v42 = vadd.f32 %v1097_v57, %v3166_v43 }
 0x164   : > { %2419 = vmatmul.msk.f32.gmra.mxu1 %vm445_vm9, %v1811_v45  ;;  %1786 = vmatmul.bf16.gmra.mxu0 %v3100_v60  ;;  %v1814_v60 = vld [vmem:[#allocation2 + $0x40] sm:$0xff] }
 0x167   : > { %v1211_v61 = vpop.f32.mrf.mxu3 }
 0x168   : > { %v1099_v1 = vpop.f32.mrf.mxu2  ;;  %v1231_v45 = vadd.f32 %v1211_v61, %v1117_v42 }
 0x169   : > { %v996_v50 = vpop.f32.mrf.mxu1  ;;  %v921_v53 = vpop.f32.mrf.mxu0 }
 0x16a   : > { %v3173_v13 = vadd.f32 %v996_v50, %v919_v46 }
 0x16c   : > { %2420 = vmatmul.msk.f32.gmra.mxu1 %vm445_vm9, %v1812_v52 }
 0x16f   : > { %v1213_v4 = vpop.f32.mrf.mxu3 }
 0x170   : > { %v1102_v11 = vpop.f32.mrf.mxu2 }
 0x171   : > { %v998_v54 = vpop.f32.mrf.mxu1  ;;  %v924_v48 = vpop.f32.mrf.mxu0 }
 0x172   : > { %v3176_v59 = vadd.f32 %v998_v54, %v921_v53 }
 0x174   : > { %2421 = vmatmul.msk.f32.gmra.mxu1 %vm445_vm9, %v1813_v47  ;;  %1791 = vmatmul.bf16.gmra.mxu0 %v3126_v22  ;;  %v1118_v47 = vadd.f32 %v1099_v1, %v3169_v49  ;;  %v1119_v49 = vadd.f32 %v1102_v11, %v3173_v13 }
 0x177   : > { %v1216_v14 = vpop.f32.mrf.mxu3 }
 0x178   : > { %v3189_v17 = vpop.f32.mrf.mxu2 }
 0x179   : > { %v1001_v62 = vpop.f32.mrf.mxu1  ;;  %v926_v63 = vpop.f32.mrf.mxu0 }
 0x17a   : > { %v3180_v0 = vadd.f32 %v1001_v62, %v924_v48  ;;  %v1232_v62 = vadd.f32 %v1213_v4, %v1118_v47  ;;  %v1233_v4 = vadd.f32 %v1216_v14, %v1119_v49 }
 0x17c   : > { %2422 = vmatmul.msk.f32.gmra.mxu1 %vm445_vm9, %v1814_v60 }
 0x17f   : > { %v3191_v21 = vpop.f32.mrf.mxu3 }
 0x180   : > { %v3196_v24 = vpop.f32.mrf.mxu2 }
 0x181   : > { %v1003_v3 = vpop.f32.mrf.mxu1  ;;  %v929_v26 = vpop.f32.mrf.mxu0 }
 0x182   : > { %v3183_v25 = vadd.f32 %v1003_v3, %v926_v63 }
 0x184   : > { %2423 = vmatmul.msk.f32.gmra.mxu1 %vm445_vm9, %v1815_v9  ;;  %1796 = vmatmul.bf16.gmra.mxu0 %v1707_v27 }
 0x187   : > { %v3198_v6 = vpop.f32.mrf.mxu3 }
 0x188   : > { %v3200_v37 = vpop.f32.mrf.mxu2 }
 0x189   : > { %v1006_v15 = vpop.f32.mrf.mxu1  ;;  %v931_v56 = vpop.f32.mrf.mxu0 }
 0x18a   : > { %v3186_v16 = vadd.f32 %v1006_v15, %v929_v26 }
 0x18c   : > { %2424 = vmatmul.msk.f32.gmra.mxu1 %vm445_vm9, %v1816_v55 }
 0x18f   : > { %v3202_v10 = vpop.f32.mrf.mxu3 }
 0x190   : > { %v3204_v30 = vpop.f32.mrf.mxu2 }
 0x191   : > { %v1008_v18 = vpop.f32.mrf.mxu1  ;;  %v1325_v20 = vpop.f32.mrf.mxu0 }
 0x192   : > { %v3193_v22 = vadd.f32 %v1008_v18, %v931_v56  ;;  %v1345_v50 = vadd.f32 %v1325_v20, %v1231_v45 }
 0x194   : > { %2425 = vmatmul.msk.f32.gmra.mxu1 %vm445_vm9, %v1817_v19 }
 0x197   : > { %v3206_v12 = vpop.f32.mrf.mxu3 }
 0x198   : > { %v3210_v8 = vpop.f32.mrf.mxu2 }
 0x199   : > { %v1439_v2 = vpop.f32.mrf.mxu1  ;;  %v1327_v23 = vpop.f32.mrf.mxu0 }
 0x19a   : > { %v1459_v54 = vadd.f32 %v1439_v2, %v1345_v50  ;;  %v1346_v7 = vadd.f32 %v1327_v23, %v1232_v62  ;;  %v1122_v62 = vadd.f32 %v3200_v37, %v3183_v25 }
 0x19f   : > { %v3216_v34 = vpop.f32.mrf.mxu3 }
 0x1a0   : > { %v1554_v40 = vpop.f32.mrf.mxu2 }
 0x1a1   : > { %v1441_v29 = vpop.f32.mrf.mxu1  ;;  %v1330_v31 = vpop.f32.mrf.mxu0  ;;  %v1574_v48 = vadd.f32 %v1554_v40, %v1459_v54 }
 0x1a2   : > { %v1460_v61 = vadd.f32 %v1441_v29, %v1346_v7  ;;  %v1347_v15 = vadd.f32 %v1330_v31, %v1233_v4  ;;  %v1120_v29 = vadd.f32 %v3189_v17, %v3176_v59 }
 0x1a4   : > { %v1234_v13 = vadd.f32 %v3191_v21, %v1120_v29 }
 0x1a7   : > { %v1668_v41 = vpop.f32.mrf.mxu3 }
 0x1a8   : > { %v1556_v44 = vpop.f32.mrf.mxu2  ;;  %v1688_v60 = vadd.f32 %v1668_v41, %v1574_v48 }
 0x1a9   : > { %v1444_v28 = vpop.f32.mrf.mxu1  ;;  %v1332_v32 = vpop.f32.mrf.mxu0  ;;  %v1575_v1 = vadd.f32 %v1556_v44, %v1460_v61 }
 0x1aa   : > { %v1461_v20 = vadd.f32 %v1444_v28, %v1347_v15  ;;  %v1348_v41 = vadd.f32 %v1332_v32, %v1234_v13  ;;  %v1121_v28 = vadd.f32 %v3196_v24, %v3180_v0  ;;  %v1236_v24 = vadd.f32 %v3202_v10, %v1122_v62 }
 0x1ab   : > { %v1124_v15 = vadd.f32 %v3210_v8, %v3193_v22 }
 0x1ac   : > { %v1235_v59 = vadd.f32 %v3198_v6, %v1121_v28 }
 0x1af   : > { %v1670_v46 = vpop.f32.mrf.mxu3 }
 0x1b0   : > { %v1559_v63 = vpop.f32.mrf.mxu2  ;;  %v1689_v27 = vadd.f32 %v1670_v46, %v1575_v1 }
 0x1b1   : > { %v1446_v51 = vpop.f32.mrf.mxu1  ;;  %v3208_v58 = vpop.f32.mrf.mxu0  ;;  %v1576_v40 = vadd.f32 %v1559_v63, %v1461_v20 }
 0x1b2   : > { %v1462_v44 = vadd.f32 %v1446_v51, %v1348_v41  ;;  %v1349_v21 = vadd.f32 %v3208_v58, %v1235_v59 }
 0x1b7   : > { %v1673_v3 = vpop.f32.mrf.mxu3 }
 0x1b8   : > { %v1561_v55 = vpop.f32.mrf.mxu2  ;;  %v1690_v11 = vadd.f32 %v1673_v3, %v1576_v40 }
 0x1b9   : > { %v3212_v5 = vpop.f32.mrf.mxu1  ;;  %v3214_v38 = vpop.f32.mrf.mxu0  ;;  %v1577_v50 = vadd.f32 %v1561_v55, %v1462_v44 }
 0x1ba   : > { %v1463_v48 = vadd.f32 %v3212_v5, %v1349_v21  ;;  %v1350_v7 = vadd.f32 %v3214_v38, %v1236_v24 }
 0x1bf   : > { %v1675_v23 = vpop.f32.mrf.mxu3 }
 0x1c0   : > { %v1564_v46 = vpop.f32.mrf.mxu2  ;;  %v1691_v17 = vadd.f32 %v1675_v23, %v1577_v50 }
 0x1c1   : > { %v3218_v35 = vpop.f32.mrf.mxu1  ;;  %v3220_v39 = vpop.f32.mrf.mxu0 }
 0x1c8   : > { %v1566_v0 = vpop.f32.mrf.mxu2 }
 0x1c9   : > { %v3222_v33 = vpop.f32.mrf.mxu1  ;;  %v3224_v36 = vpop.f32.mrf.mxu0 }
 0x1d0   : > { %v1569_v10 = vpop.f32.mrf.mxu2 }
 0x1d1   : > { %v3227_v52 = vpop.f32.mrf.mxu1  ;;  %v1782_v53 = vpop.f32.mrf.mxu0 }
 0x1d2   : > { %v1802_v9 = vadd.f32 %v1782_v53, %v1688_v60  ;;  %v1678_v53 = vpop.f32.mrf.mxu3  ;;  %v1578_v60 = vadd.f32 %v1564_v46, %v1463_v48 }
 0x1d4   : > { %v1692_v63 = vadd.f32 %v1678_v53, %v1578_v60 }
 0x1d9   : > { %v1861_v43 = vpop.f32.mrf.mxu1  ;;  %v1784_v57 = vpop.f32.mrf.mxu0 }
 0x1da   : > { %v1885_v26 = vadd.f32 %v1861_v43, %v1802_v9  ;;  %v1803_v56 = vadd.f32 %v1784_v57, %v1689_v27  ;;  %v1680_v6 = vpop.f32.mrf.mxu3  ;;  %v1464_v43 = vadd.f32 %v3218_v35, %v1350_v7  ;;  %v1123_v57 = vadd.f32 %v3204_v30, %v3186_v16 }
 0x1db   : > { %v1238_v30 = vadd.f32 %v3216_v34, %v1124_v15 }
 0x1dc   : > { %1893 = vst [vmem:[%s3234_s18] sm:$0xff] %v1885_v26  ;;  %v1579_v25 = vadd.f32 %v1566_v0, %v1464_v43  ;;  %v1237_v37 = vadd.f32 %v3206_v12, %v1123_v57 }
 0x1dd   : > { %v1352_v55 = vadd.f32 %v3224_v36, %v1238_v30 }
 0x1de   : > { %v1693_v61 = vadd.f32 %v1680_v6, %v1579_v25  ;;  %v1351_v26 = vadd.f32 %v3220_v39, %v1237_v37 }
 0x1e0   : > { %v1465_v4 = vadd.f32 %v3222_v33, %v1351_v26 }
 0x1e1   : > { %v1864_v18 = vpop.f32.mrf.mxu1  ;;  %v1787_v19 = vpop.f32.mrf.mxu0 }
 0x1e2   : > { %v1886_v2 = vadd.f32 %v1864_v18, %v1803_v56  ;;  %v1804_v14 = vadd.f32 %v1787_v19, %v1690_v11  ;;  %v1683_v38 = vpop.f32.mrf.mxu3  ;;  %v1580_v16 = vadd.f32 %v1569_v10, %v1465_v4  ;;  %v1571_v56 = vpop.f32.mrf.mxu2  ;;  %v1466_v19 = vadd.f32 %v3227_v52, %v1352_v55 }
 0x1e4   : > { %1894 = vst [vmem:[%s3234_s18 + $0x8] sm:$0xff] %v1886_v2  ;;  %v1694_v12 = vadd.f32 %v1683_v38, %v1580_v16  ;;  %v1581_v2 = vadd.f32 %v1571_v56, %v1466_v19 }
 0x1e9   : > { %v1867_v42 = vpop.f32.mrf.mxu1  ;;  %v1789_v31 = vpop.f32.mrf.mxu0 }
 0x1ea   : > { %v1887_v45 = vadd.f32 %v1867_v42, %v1804_v14  ;;  %v1805_v54 = vadd.f32 %v1789_v31, %v1691_v17  ;;  %v1685_v20 = vpop.f32.mrf.mxu3 }
 0x1eb   : > { %v1695_v29 = vadd.f32 %v1685_v20, %v1581_v2 }
 0x1ec   : > { %1895 = vst [vmem:[%s3234_s18 + $0x10] sm:$0xff] %v1887_v45 }
 0x1f1   : > { %v1870_v32 = vpop.f32.mrf.mxu1  ;;  %v1792_v47 = vpop.f32.mrf.mxu0 }
 0x1f2   : > { %v1888_v51 = vadd.f32 %v1870_v32, %v1805_v54  ;;  %v1806_v58 = vadd.f32 %v1792_v47, %v1692_v63 }
 0x1f4   : > { %1896 = vst [vmem:[%s3234_s18 + $0x18] sm:$0xff] %v1888_v51 }
 0x1f9   : > { %v1873_v3 = vpop.f32.mrf.mxu1  ;;  %v1794_v9 = vpop.f32.mrf.mxu0 }
 0x1fa   : > { %v1889_v5 = vadd.f32 %v1873_v3, %v1806_v58  ;;  %v1807_v49 = vadd.f32 %v1794_v9, %v1693_v61 }
 0x1fc   : > { %1897 = vst [vmem:[%s3234_s18 + $0x20] sm:$0xff] %v1889_v5 }
 0x201   : > { %v1876_v1 = vpop.f32.mrf.mxu1  ;;  %v1797_v27 = vpop.f32.mrf.mxu0 }
 0x202   : > { %v1890_v35 = vadd.f32 %v1876_v1, %v1807_v49  ;;  %v1808_v39 = vadd.f32 %v1797_v27, %v1694_v12 }
 0x204   : > { %1898 = vst [vmem:[%s3234_s18 + $0x28] sm:$0xff] %v1890_v35 }
 0x209   : > { %v1879_v18 = vpop.f32.mrf.mxu1  ;;  %v1799_v23 = vpop.f32.mrf.mxu0 }
 0x20a   : > { %v1891_v33 = vadd.f32 %v1879_v18, %v1808_v39  ;;  %v1809_v22 = vadd.f32 %v1799_v23, %v1695_v29 }
 0x20c   : > { %1899 = vst [vmem:[%s3234_s18 + $0x30] sm:$0xff] %v1891_v33 }
 0x211   : > { %v1882_v8 = vpop.f32.mrf.mxu1 }
 0x212   : > { %v1892_v40 = vadd.f32 %v1882_v8, %v1809_v22 }
 0x214   : > { %1900 = vst [vmem:[%s3234_s18 + $0x38] sm:$0xff] %v1892_v40 }
 0x215 PF: > { %s18_s27 = sadd.s32 1, %s2528_s27  }
 0x216   : > { %p15_p4 = scmp.ge.s32.totalorder %s18_s27, 4  }
 0x218   :  { %17 = sbr.rel (!%p15_p4) target bundleno = 1 (0x1), region = 96 }

</bundles_post_ra>
